<compile_context>
chip_gen: v7x
topology: tpu7x:2x2x1
jax: 0.10.0
libtpu: 0.0.40
codegen_flags: <defaults>
</compile_context>

<pallas_src>
import math
from functools import partial

import jax
import jax.numpy as jnp
import numpy as np
from jax.experimental import pallas as pl
from jax.experimental.pallas import tpu as pltpu

_EPS = 1e-5
_VMEM = pl.BlockSpec(memory_space=pltpu.MemorySpace.VMEM)


# ----------------------------------------------------------------------------
# Fused Pallas kernels
# ----------------------------------------------------------------------------
def _bn_train(x, gamma, beta):
    """Training-mode BatchNorm2d over the rows of a (M, C) tile, M = N*H*W."""
    mean = jnp.mean(x, axis=0, keepdims=True)
    centered = x - mean
    var = jnp.mean(centered * centered, axis=0, keepdims=True)   # biased variance
    scale = jax.lax.rsqrt(var + _EPS) * gamma                    # fold gamma (1,C)
    return centered * scale + beta


def _conv_bn_relu_kernel(col_ref, w_ref, g_ref, b_ref, o_ref):
    # Stage 1: conv (im2col matmul, bf16 x bf16 -> f32 on the MXU) + BN1 + ReLU.
    acc = jnp.dot(col_ref[...], w_ref[...], preferred_element_type=jnp.float32)
    o_ref[...] = jnp.maximum(_bn_train(acc, g_ref[...], b_ref[...]), 0.0)


def _conv_bn_add_relu_id_kernel(col_ref, w_ref, g_ref, b_ref, short_ref, o_ref):
    # Stage 2, identity shortcut: conv + BN2 + residual add + ReLU.
    acc = jnp.dot(col_ref[...], w_ref[...], preferred_element_type=jnp.float32)
    y = _bn_train(acc, g_ref[...], b_ref[...])
    o_ref[...] = jnp.maximum(y + short_ref[...], 0.0)


def _conv_bn_add_relu_proj_kernel(col_ref, w_ref, g_ref, b_ref,
                                  xs_ref, ws_ref, gs_ref, bs_ref, o_ref):
    # Stage 2, projection shortcut: main conv + BN2, shortcut 1x1 conv + BN,
    # residual add, ReLU — all in a single kernel.
    acc = jnp.dot(col_ref[...], w_ref[...], preferred_element_type=jnp.float32)
    y = _bn_train(acc, g_ref[...], b_ref[...])
    s = jnp.dot(xs_ref[...], ws_ref[...], preferred_element_type=jnp.float32)
    sy = _bn_train(s, gs_ref[...], bs_ref[...])
    o_ref[...] = jnp.maximum(y + sy, 0.0)


def _call(kernel, out_rows, out_cols, *args):
    return pl.pallas_call(
        kernel,
        out_shape=jax.ShapeDtypeStruct((out_rows, out_cols), jnp.float32),
        in_specs=[_VMEM] * len(args),
        out_specs=_VMEM,
    )(*args)


# ----------------------------------------------------------------------------
# Wrapper glue (im2col / padding / layout) + SimpleBlock forward
# ----------------------------------------------------------------------------
def _im2col_3x3(x_nhwc, stride, padding):
    """(N,H,W,C) -> (N*Ho*Wo, 9*C), K ordered (kh, kw, c) to match HWIO reshape."""
    N, H, W, C = x_nhwc.shape
    xp = jnp.pad(x_nhwc, ((0, 0), (padding, padding), (padding, padding), (0, 0)))
    Ho = (H + 2 * padding - 3) // stride + 1
    Wo = (W + 2 * padding - 3) // stride + 1
    taps = []
    for kh in range(3):
        for kw in range(3):
            taps.append(xp[:, kh:kh + stride * (Ho - 1) + 1:stride,
                            kw:kw + stride * (Wo - 1) + 1:stride, :])
    col = jnp.concatenate(taps, axis=-1).reshape(N * Ho * Wo, 9 * C)
    return col, Ho, Wo


@partial(jax.jit, static_argnames=("half_res",))
def simple_block_forward(x_nchw, params, *, half_res):
    """SimpleBlock.forward.  x: (N, Cin, H, W) NCHW; params: dict of arrays.

    w1: (3,3,Cin,Cout), w2: (3,3,Cout,Cout), g1/b1/g2/b2: (Cout,);
    ws: (1,1,Cin,Cout), gs, bs present iff indim != outdim (projection shortcut).
    Returns NCHW output, like the PyTorch module.
    """
    w1 = params["w1"]
    Cin, Cout = w1.shape[2], w1.shape[3]
    stride = 2 if half_res else 1
    N, C, H, W = x_nchw.shape
    assert C == Cin
    x = jnp.transpose(x_nchw, (0, 2, 3, 1)).astype(jnp.float32)      # NHWC, f32
    x_bf = x.astype(jnp.bfloat16)                                     # MXU operand copy

    # ---- Stage 1: C1(3x3, stride, pad 1, no bias) + BN1 + ReLU  (1 pallas_call)
    col1, Ho, Wo = _im2col_3x3(x_bf, stride, 1)                       # bf16 in HBM
    y1 = _call(_conv_bn_relu_kernel, N * Ho * Wo, Cout,
               col1,
               w1.reshape(9 * Cin, Cout).astype(jnp.bfloat16),
               params["g1"].reshape(1, Cout).astype(jnp.float32),
               params["b1"].reshape(1, Cout).astype(jnp.float32))
    y1 = y1.reshape(N, Ho, Wo, Cout)

    # ---- Stage 2: C2(3x3, 1, pad 1) + BN2 + shortcut + add + ReLU  (1 pallas_call)
    col2, Ho2, Wo2 = _im2col_3x3(y1.astype(jnp.bfloat16), 1, 1)       # bf16 in HBM
    M2 = N * Ho2 * Wo2
    w2m = params["w2"].reshape(9 * Cout, Cout).astype(jnp.bfloat16)
    g2 = params["g2"].reshape(1, Cout).astype(jnp.float32)
    b2 = params["b2"].reshape(1, Cout).astype(jnp.float32)

    if "ws" in params:
        # Projection shortcut: 1x1 conv (same stride, no padding) + BNshortcut.
        xs = x_bf[:, ::stride, ::stride, :].reshape(N * Ho * Wo, Cin)
        out = _call(_conv_bn_add_relu_proj_kernel, M2, Cout,
                    col2, w2m, g2, b2,
                    xs,
                    params["ws"].reshape(Cin, Cout).astype(jnp.bfloat16),
                    params["gs"].reshape(1, Cout).astype(jnp.float32),
                    params["bs"].reshape(1, Cout).astype(jnp.float32))
    else:
        # Identity shortcut (valid only when Cin == Cout and stride == 1,
        # exactly as in the PyTorch module).  Added in f32 for accuracy.
        assert Cin == Cout and stride == 1
        short = x.reshape(N * H * W, Cout)
        out = _call(_conv_bn_add_relu_id_kernel, M2, Cout,
                    col2, w2m, g2, b2, short)

    return jnp.transpose(out.reshape(N, Ho2, Wo2, Cout), (0, 3, 1, 2))


# ----------------------------------------------------------------------------
# Pure-JAX reference (correctness check only)
# ----------------------------------------------------------------------------
def _ref_simple_block(x_nchw, params, *, half_res):
    stride = 2 if half_res else 1
    x = jnp.transpose(x_nchw, (0, 2, 3, 1)).astype(jnp.float32)

    def conv(v, w, s, p):
        return jax.lax.conv_general_dilated(
            v, w, (s, s), [(p, p), (p, p)],
            dimension_numbers=("NHWC", "HWIO", "NHWC"),
            precision=jax.lax.Precision.HIGHEST)

    def bn(v, g, b):
        mean = jnp.mean(v, axis=(0, 1, 2), keepdims=True)
        var = jnp.mean((v - mean) ** 2, axis=(0, 1, 2), keepdims=True)
        return ((v - mean) * jax.lax.rsqrt(var + _EPS)
                * g.reshape(1, 1, 1, -1) + b.reshape(1, 1, 1, -1))

    y = jnp.maximum(bn(conv(x, params["w1"], stride, 1), params["g1"], params["b1"]), 0.0)
    y = bn(conv(y, params["w2"], 1, 1), params["g2"], params["b2"])
    if "ws" in params:
        s = bn(conv(x, params["ws"], stride, 0), params["gs"], params["bs"])
    else:
        s = x
    return jnp.transpose(jnp.maximum(y + s, 0.0), (0, 3, 1, 2))


# ----------------------------------------------------------------------------
# Main
# ----------------------------------------------------------------------------
def _make_params(key, indim, outdim, proj):
    ks = jax.random.split(key, 9)
    std3 = math.sqrt(2.0 / float(3 * 3 * outdim))          # init_layer for 3x3 conv
    p = {
        "w1": std3 * jax.random.normal(ks[0], (3, 3, indim, outdim), jnp.float32),
        "w2": std3 * jax.random.normal(ks[1], (3, 3, outdim, outdim), jnp.float32),
        # init_layer sets BN weight=1, bias=0; perturb slightly so the
        # gamma/beta plumbing is actually exercised by the check.
        "g1": 1.0 + 0.1 * jax.random.normal(ks[2], (outdim,), jnp.float32),
        "b1": 0.1 * jax.random.normal(ks[3], (outdim,), jnp.float32),
        "g2": 1.0 + 0.1 * jax.random.normal(ks[4], (outdim,), jnp.float32),
        "b2": 0.1 * jax.random.normal(ks[5], (outdim,), jnp.float32),
    }
    if proj:
        std1 = math.sqrt(2.0 / float(1 * 1 * outdim))       # init_layer for 1x1 conv
        p["ws"] = std1 * jax.random.normal(ks[6], (1, 1, indim, outdim), jnp.float32)
        p["gs"] = 1.0 + 0.1 * jax.random.normal(ks[7], (outdim,), jnp.float32)
        p["bs"] = 0.1 * jax.random.normal(ks[8], (outdim,), jnp.float32)
    return p


if __name__ == "__main__":
    key = jax.random.PRNGKey(0)
    k_x1, k_p1, k_x2, k_p2 = jax.random.split(key, 4)

    # Config A: indim != outdim, half_res=True -> 1x1-conv + BN projection shortcut.
    N, Cin, H, W, Cout = 2, 16, 16, 16, 32
    x_a = jax.random.normal(k_x1, (N, Cin, H, W), jnp.float32)
    p_a = _make_params(k_p1, Cin, Cout, proj=True)
    out_a = jax.block_until_ready(simple_block_forward(x_a, p_a, half_res=True))
    assert out_a.shape == (N, Cout, H // 2, W // 2), out_a.shape
    ref_a = jax.block_until_ready(_ref_simple_block(x_a, p_a, half_res=True))
    if not np.allclose(np.asarray(out_a), np.asarray(ref_a), atol=2e-2, rtol=2e-2):
        err = float(np.max(np.abs(np.asarray(out_a) - np.asarray(ref_a))))
        raise AssertionError(f"projection-shortcut block mismatch, max_err={err}")

    # Config B: indim == outdim, half_res=False -> identity shortcut.
    x_b = jax.random.normal(k_x2, (N, Cout, H, W), jnp.float32)
    p_b = _make_params(k_p2, Cout, Cout, proj=False)
    out_b = jax.block_until_ready(simple_block_forward(x_b, p_b, half_res=False))
    assert out_b.shape == (N, Cout, H, W), out_b.shape
    ref_b = jax.block_until_ready(_ref_simple_block(x_b, p_b, half_res=False))
    if not np.allclose(np.asarray(out_b), np.asarray(ref_b), atol=2e-2, rtol=2e-2):
        err = float(np.max(np.abs(np.asarray(out_b) - np.asarray(ref_b))))
        raise AssertionError(f"identity-shortcut block mismatch, max_err={err}")

    print("KERNEL_OK")
</pallas_src>

<mosaic_0001>
module attributes {stable_mosaic.version = 11 : i64} {
  func.func @_conv_bn_relu_kernel(%arg0: memref<128x144xbf16, #tpu.memory_space<vmem>>, %arg1: memref<144x32xbf16, #tpu.memory_space<vmem>>, %arg2: memref<1x32xf32, #tpu.memory_space<vmem>>, %arg3: memref<1x32xf32, #tpu.memory_space<vmem>>, %arg4: memref<128x32xf32, #tpu.memory_space<vmem>>) attributes {dimension_semantics = [], scalar_prefetch = 0 : i64, scratch_operands = 0 : i64, tpu.core_type = #tpu.core_type<tc>} {
    %c0 = arith.constant 0 : index
    %c0_0 = arith.constant 0 : index
    %0 = vector.load %arg0[%c0, %c0_0] : memref<128x144xbf16, #tpu.memory_space<vmem>>, vector<128x144xbf16>
    %c0_1 = arith.constant 0 : index
    %c0_2 = arith.constant 0 : index
    %1 = vector.load %arg1[%c0_1, %c0_2] : memref<144x32xbf16, #tpu.memory_space<vmem>>, vector<144x32xbf16>
    %cst = arith.constant dense<0.000000e+00> : vector<128x32xf32>
    %2 = tpu.matmul %0, %1, %cst {dimension_numbers = #tpu.dot_dimension_numbers<[1], [0], [0], [1], [0, 0, 1, 1], [], []>} : vector<128x144xbf16>, vector<144x32xbf16>, vector<128x32xf32> -> vector<128x32xf32>
    %c0_3 = arith.constant 0 : index
    %c0_4 = arith.constant 0 : index
    %3 = vector.load %arg2[%c0_3, %c0_4] : memref<1x32xf32, #tpu.memory_space<vmem>>, vector<1x32xf32>
    %c0_5 = arith.constant 0 : index
    %c0_6 = arith.constant 0 : index
    %4 = vector.load %arg3[%c0_5, %c0_6] : memref<1x32xf32, #tpu.memory_space<vmem>>, vector<1x32xf32>
    %cst_7 = arith.constant dense<0.000000e+00> : vector<32xf32>
    %5 = vector.multi_reduction <add>, %2, %cst_7 [0] : vector<128x32xf32> to vector<32xf32>
    %6 = vector.shape_cast %5 : vector<32xf32> to vector<1x32xf32>
    %cst_8 = arith.constant 1.280000e+02 : f32
    %7 = vector.broadcast %cst_8 : f32 to vector<1x32xf32>
    %8 = arith.divf %6, %7 : vector<1x32xf32>
    %9 = vector.broadcast %8 : vector<1x32xf32> to vector<128x32xf32>
    %10 = arith.subf %2, %9 : vector<128x32xf32>
    %11 = arith.mulf %10, %10 : vector<128x32xf32>
    %cst_9 = arith.constant dense<0.000000e+00> : vector<32xf32>
    %12 = vector.multi_reduction <add>, %11, %cst_9 [0] : vector<128x32xf32> to vector<32xf32>
    %13 = vector.shape_cast %12 : vector<32xf32> to vector<1x32xf32>
    %cst_10 = arith.constant 1.280000e+02 : f32
    %14 = vector.broadcast %cst_10 : f32 to vector<1x32xf32>
    %15 = arith.divf %13, %14 : vector<1x32xf32>
    %cst_11 = arith.constant 9.99999974E-6 : f32
    %16 = vector.broadcast %cst_11 : f32 to vector<1x32xf32>
    %17 = arith.addf %15, %16 : vector<1x32xf32>
    %18 = math.rsqrt %17 : vector<1x32xf32>
    %19 = arith.mulf %18, %3 : vector<1x32xf32>
    %20 = vector.broadcast %19 : vector<1x32xf32> to vector<128x32xf32>
    %21 = arith.mulf %10, %20 : vector<128x32xf32>
    %22 = vector.broadcast %4 : vector<1x32xf32> to vector<128x32xf32>
    %23 = arith.addf %21, %22 : vector<128x32xf32>
    %cst_12 = arith.constant 0.000000e+00 : f32
    %24 = vector.broadcast %cst_12 : f32 to vector<128x32xf32>
    %25 = arith.maximumf %23, %24 : vector<128x32xf32>
    %c0_13 = arith.constant 0 : index
    %c0_14 = arith.constant 0 : index
    %26 = vector.load %arg4[%c0_13, %c0_14] : memref<128x32xf32, #tpu.memory_space<vmem>>, vector<128x32xf32>
    tpu.vector_store %arg4[%c0_13, %c0_14], %25 {strides = array<i32>} : memref<128x32xf32, #tpu.memory_space<vmem>>, vector<128x32xf32>,
    return
  }
}

module attributes {stable_mosaic.version = 11 : i64} {
  func.func @_conv_bn_add_relu_proj_kernel(%arg0: memref<128x288xbf16, #tpu.memory_space<vmem>>, %arg1: memref<288x32xbf16, #tpu.memory_space<vmem>>, %arg2: memref<1x32xf32, #tpu.memory_space<vmem>>, %arg3: memref<1x32xf32, #tpu.memory_space<vmem>>, %arg4: memref<128x16xbf16, #tpu.memory_space<vmem>>, %arg5: memref<16x32xbf16, #tpu.memory_space<vmem>>, %arg6: memref<1x32xf32, #tpu.memory_space<vmem>>, %arg7: memref<1x32xf32, #tpu.memory_space<vmem>>, %arg8: memref<128x32xf32, #tpu.memory_space<vmem>>) attributes {dimension_semantics = [], scalar_prefetch = 0 : i64, scratch_operands = 0 : i64, tpu.core_type = #tpu.core_type<tc>} {
    %c0 = arith.constant 0 : index
    %c0_0 = arith.constant 0 : index
    %0 = vector.load %arg0[%c0, %c0_0] : memref<128x288xbf16, #tpu.memory_space<vmem>>, vector<128x288xbf16>
    %c0_1 = arith.constant 0 : index
    %c0_2 = arith.constant 0 : index
    %1 = vector.load %arg1[%c0_1, %c0_2] : memref<288x32xbf16, #tpu.memory_space<vmem>>, vector<288x32xbf16>
    %cst = arith.constant dense<0.000000e+00> : vector<128x32xf32>
    %2 = tpu.matmul %0, %1, %cst {dimension_numbers = #tpu.dot_dimension_numbers<[1], [0], [0], [1], [0, 0, 1, 1], [], []>} : vector<128x288xbf16>, vector<288x32xbf16>, vector<128x32xf32> -> vector<128x32xf32>
    %c0_3 = arith.constant 0 : index
    %c0_4 = arith.constant 0 : index
    %3 = vector.load %arg2[%c0_3, %c0_4] : memref<1x32xf32, #tpu.memory_space<vmem>>, vector<1x32xf32>
    %c0_5 = arith.constant 0 : index
    %c0_6 = arith.constant 0 : index
    %4 = vector.load %arg3[%c0_5, %c0_6] : memref<1x32xf32, #tpu.memory_space<vmem>>, vector<1x32xf32>
    %cst_7 = arith.constant dense<0.000000e+00> : vector<32xf32>
    %5 = vector.multi_reduction <add>, %2, %cst_7 [0] : vector<128x32xf32> to vector<32xf32>
    %6 = vector.shape_cast %5 : vector<32xf32> to vector<1x32xf32>
    %cst_8 = arith.constant 1.280000e+02 : f32
    %7 = vector.broadcast %cst_8 : f32 to vector<1x32xf32>
    %8 = arith.divf %6, %7 : vector<1x32xf32>
    %9 = vector.broadcast %8 : vector<1x32xf32> to vector<128x32xf32>
    %10 = arith.subf %2, %9 : vector<128x32xf32>
    %11 = arith.mulf %10, %10 : vector<128x32xf32>
    %cst_9 = arith.constant dense<0.000000e+00> : vector<32xf32>
    %12 = vector.multi_reduction <add>, %11, %cst_9 [0] : vector<128x32xf32> to vector<32xf32>
    %13 = vector.shape_cast %12 : vector<32xf32> to vector<1x32xf32>
    %cst_10 = arith.constant 1.280000e+02 : f32
    %14 = vector.broadcast %cst_10 : f32 to vector<1x32xf32>
    %15 = arith.divf %13, %14 : vector<1x32xf32>
    %cst_11 = arith.constant 9.99999974E-6 : f32
    %16 = vector.broadcast %cst_11 : f32 to vector<1x32xf32>
    %17 = arith.addf %15, %16 : vector<1x32xf32>
    %18 = math.rsqrt %17 : vector<1x32xf32>
    %19 = arith.mulf %18, %3 : vector<1x32xf32>
    %20 = vector.broadcast %19 : vector<1x32xf32> to vector<128x32xf32>
    %21 = arith.mulf %10, %20 : vector<128x32xf32>
    %22 = vector.broadcast %4 : vector<1x32xf32> to vector<128x32xf32>
    %23 = arith.addf %21, %22 : vector<128x32xf32>
    %c0_12 = arith.constant 0 : index
    %c0_13 = arith.constant 0 : index
    %24 = vector.load %arg4[%c0_12, %c0_13] : memref<128x16xbf16, #tpu.memory_space<vmem>>, vector<128x16xbf16>
    %c0_14 = arith.constant 0 : index
    %c0_15 = arith.constant 0 : index
    %25 = vector.load %arg5[%c0_14, %c0_15] : memref<16x32xbf16, #tpu.memory_space<vmem>>, vector<16x32xbf16>
    %cst_16 = arith.constant dense<0.000000e+00> : vector<128x32xf32>
    %26 = tpu.matmul %24, %25, %cst_16 {dimension_numbers = #tpu.dot_dimension_numbers<[1], [0], [0], [1], [0, 0, 1, 1], [], []>} : vector<128x16xbf16>, vector<16x32xbf16>, vector<128x32xf32> -> vector<128x32xf32>
    %c0_17 = arith.constant 0 : index
    %c0_18 = arith.constant 0 : index
    %27 = vector.load %arg6[%c0_17, %c0_18] : memref<1x32xf32, #tpu.memory_space<vmem>>, vector<1x32xf32>
    %c0_19 = arith.constant 0 : index
    %c0_20 = arith.constant 0 : index
    %28 = vector.load %arg7[%c0_19, %c0_20] : memref<1x32xf32, #tpu.memory_space<vmem>>, vector<1x32xf32>
    %cst_21 = arith.constant dense<0.000000e+00> : vector<32xf32>
    %29 = vector.multi_reduction <add>, %26, %cst_21 [0] : vector<128x32xf32> to vector<32xf32>
    %30 = vector.shape_cast %29 : vector<32xf32> to vector<1x32xf32>
    %cst_22 = arith.constant 1.280000e+02 : f32
    %31 = vector.broadcast %cst_22 : f32 to vector<1x32xf32>
    %32 = arith.divf %30, %31 : vector<1x32xf32>
    %33 = vector.broadcast %32 : vector<1x32xf32> to vector<128x32xf32>
    %34 = arith.subf %26, %33 : vector<128x32xf32>
    %35 = arith.mulf %34, %34 : vector<128x32xf32>
    %cst_23 = arith.constant dense<0.000000e+00> : vector<32xf32>
    %36 = vector.multi_reduction <add>, %35, %cst_23 [0] : vector<128x32xf32> to vector<32xf32>
    %37 = vector.shape_cast %36 : vector<32xf32> to vector<1x32xf32>
    %cst_24 = arith.constant 1.280000e+02 : f32
    %38 = vector.broadcast %cst_24 : f32 to vector<1x32xf32>
    %39 = arith.divf %37, %38 : vector<1x32xf32>
    %cst_25 = arith.constant 9.99999974E-6 : f32
    %40 = vector.broadcast %cst_25 : f32 to vector<1x32xf32>
    %41 = arith.addf %39, %40 : vector<1x32xf32>
    %42 = math.rsqrt %41 : vector<1x32xf32>
    %43 = arith.mulf %42, %27 : vector<1x32xf32>
    %44 = vector.broadcast %43 : vector<1x32xf32> to vector<128x32xf32>
    %45 = arith.mulf %34, %44 : vector<128x32xf32>
    %46 = vector.broadcast %28 : vector<1x32xf32> to vector<128x32xf32>
    %47 = arith.addf %45, %46 : vector<128x32xf32>
    %48 = arith.addf %23, %47 : vector<128x32xf32>
    %cst_26 = arith.constant 0.000000e+00 : f32
    %49 = vector.broadcast %cst_26 : f32 to vector<128x32xf32>
    %50 = arith.maximumf %48, %49 : vector<128x32xf32>
    %c0_27 = arith.constant 0 : index
    %c0_28 = arith.constant 0 : index
    %51 = vector.load %arg8[%c0_27, %c0_28] : memref<128x32xf32, #tpu.memory_space<vmem>>, vector<128x32xf32>
    tpu.vector_store %arg8[%c0_27, %c0_28], %50 {strides = array<i32>} : memref<128x32xf32, #tpu.memory_space<vmem>>, vector<128x32xf32>,
    return
  }
}

</mosaic_0001>

<bundles_post_ra>
// kernel: simple_block_forward.2
= control target key start
LH: loop header
LB: loop body
LE: loop exit
PB: predicated region body
PF: predicated region fallthrough
CT: control target
= control target key end

     0   :  { %v581_v0 = vmov 0   ;;  %vm178_vm0 = vcmask 130048   ;;  %vm302_vm1 = vcmask 261120   ;;  %s896_s1 = inlined_call_operand.vmem [shape: bf16[144,32], index: 1, kind: input, shape index: {}]   ;;  %s897_s0 = inlined_call_operand.vmem [shape: bf16[128,144], index: 0, kind: input, shape index: {}]   ;;  %s898_s2 = inlined_call_operand.vmem [shape: f32[1,32], index: 2, kind: input, shape index: {}]   ;;  %s899_s3 = inlined_call_operand.vmem [shape: f32[1,32], index: 3, kind: input, shape index: {}]   ;;  %s900_s4 = inlined_call_operand.vmem [shape: f32[128,32], index: 4, kind: output, shape index: {}]  }
   0x1   :  { %203 = vmatprep.subr.bf16.mxu0 %v581_v0  ;;  %v546_v1 = vld [vmem:[%s896_s1] sm:$0xff]   ;;  %527 = vmatprep.subr.bf16.mxu1 %v581_v0  ;;  %v547_v2 = vld [vmem:[%s896_s1 + $0x8] sm:$0xff]   ;;  %v548_v3 = vld [vmem:[%s896_s1 + $0x10] sm:$0xff]  }
   0x2   :  { %204 = vmatpush1.bf16.msra.mxu0 %v546_v1  ;;  %536 = vmatpush1.bf16.msra.mxu1 %v546_v1  ;;  %v549_v4 = vld [vmem:[%s896_s1 + $0x18] sm:$0xff]   ;;  %v557_v5 = vld [vmem:[%s897_s0 + $0x4] ss:$8 sps:$4 sm:$0xff]   ;;  %v552_v9 = vld [vmem:[%s896_s1 + $0x30] sm:$0xff]  }
   0x3   :  { %205 = vmatprep.subr.bf16.mxu0 %v581_v0  ;;  %528 = vmatprep.subr.bf16.mxu1 %v581_v0  ;;  %v563_v6 = vld [vmem:[%s897_s0 + $0x44] ss:$8 sps:$4 sm:$0xff]   ;;  %v553_v10 = vld [vmem:[%s896_s1 + $0x38] sm:$0xff]   ;;  %v555_v12 = vld [vmem:[%s897_s0] ss:$8 sps:$4 sm:$0xff]  }
   0x4   :  { %518 = vmatprep.mubr.msk.bf16.mxu0 %vm178_vm0, %v557_v5  ;;  %v550_v7 = vld [vmem:[%s896_s1 + $0x20] sm:$0xff]   ;;  %522 = vmatprep.mubr.msk.bf16.mxu1 %vm178_vm0, %v563_v6  ;;  %v551_v8 = vld [vmem:[%s896_s1 + $0x28] sm:$0xff]   ;;  %v558_v14 = vld [vmem:[%s897_s0 + $0x14] ss:$8 sps:$4 sm:$0xff]  }
   0x5   :  { %v554_v11 = vld [vmem:[%s896_s1 + $0x40] sm:$0xff]   ;;  %v567_v15 = vld [vmem:[%s897_s0 + $0x54] ss:$8 sps:$4 sm:$0xff]   ;;  %v560_v16 = vld [vmem:[%s897_s0 + $0x10] ss:$8 sps:$4 sm:$0xff]  }
   0x6   :  { %206 = vmatpush1.bf16.msra.mxu0 %v547_v2  ;;  %537 = vmatpush1.bf16.msra.mxu1 %v547_v2  ;;  %v561_v13 = vld [vmem:[%s897_s0 + $0x40] ss:$8 sps:$4 sm:$0xff]   ;;  %v569_v17 = vld [vmem:[%s897_s0 + $0x50] ss:$8 sps:$4 sm:$0xff]   ;;  %v564_v18 = vld [vmem:[%s897_s0 + $0x24] ss:$8 sps:$4 sm:$0xff]  }
   0x7   :  { %207 = vmatprep.subr.bf16.mxu0 %v581_v0  ;;  %529 = vmatprep.subr.bf16.mxu1 %v581_v0  ;;  %v573_v19 = vld [vmem:[%s897_s0 + $0x64] ss:$8 sps:$4 sm:$0xff]   ;;  %v566_v20 = vld [vmem:[%s897_s0 + $0x20] ss:$8 sps:$4 sm:$0xff]   ;;  %v570_v22 = vld [vmem:[%s897_s0 + $0x34] ss:$8 sps:$4 sm:$0xff]  }
   0x8   :  { %v575_v21 = vld [vmem:[%s897_s0 + $0x60] ss:$8 sps:$4 sm:$0xff]   ;;  %v576_v23 = vld [vmem:[%s897_s0 + $0x74] ss:$8 sps:$4 sm:$0xff]   ;;  %v572_v24 = vld [vmem:[%s897_s0 + $0x30] ss:$8 sps:$4 sm:$0xff]  }
   0x9   :  { %v578_v25 = vld [vmem:[%s897_s0 + $0x70] ss:$8 sps:$4 sm:$0xff]  }
   0xa   :  { %208 = vmatpush1.bf16.msra.mxu0 %v548_v3  ;;  %538 = vmatpush1.bf16.msra.mxu1 %v548_v3 }
   0xb   :  { %209 = vmatprep.subr.bf16.mxu0 %v581_v0  ;;  %530 = vmatprep.subr.bf16.mxu1 %v581_v0 }
   0xe   :  { %210 = vmatpush1.bf16.msra.mxu0 %v549_v4  ;;  %539 = vmatpush1.bf16.msra.mxu1 %v549_v4 }
   0xf   :  { %211 = vmatprep.subr.bf16.mxu0 %v581_v0  ;;  %531 = vmatprep.subr.bf16.mxu1 %v581_v0 }
  0x12   :  { %212 = vmatpush1.bf16.msra.mxu0 %v550_v7  ;;  %540 = vmatpush1.bf16.msra.mxu1 %v550_v7 }
  0x13   :  { %213 = vmatprep.subr.bf16.mxu0 %v581_v0  ;;  %532 = vmatprep.subr.bf16.mxu1 %v581_v0 }
  0x16   :  { %214 = vmatpush1.bf16.msra.mxu0 %v551_v8  ;;  %541 = vmatpush1.bf16.msra.mxu1 %v551_v8 }
  0x17   :  { %215 = vmatprep.subr.bf16.mxu0 %v581_v0  ;;  %533 = vmatprep.subr.bf16.mxu1 %v581_v0 }
  0x1a   :  { %216 = vmatpush1.bf16.msra.mxu0 %v552_v9  ;;  %542 = vmatpush1.bf16.msra.mxu1 %v552_v9 }
  0x1b   :  { %217 = vmatprep.subr.bf16.mxu0 %v581_v0  ;;  %534 = vmatprep.subr.bf16.mxu1 %v581_v0 }
  0x1e   :  { %218 = vmatpush1.bf16.msra.mxu0 %v553_v10  ;;  %543 = vmatpush1.bf16.msra.mxu1 %v553_v10 }
  0x1f   :  { %219 = vmatprep.subr.bf16.mxu0 %v581_v0  ;;  %535 = vmatprep.subr.bf16.mxu1 %v581_v0 }
  0x22   :  { %220 = vmatpush1.bf16.msra.mxu0 %v554_v11  ;;  %544 = vmatpush1.bf16.msra.mxu1 %v554_v11 }
  0x25   :  { %236 = vmatmul.mubr.bf16.vlgmr.msra.gmra.mrb[0].mxu0 %v555_v12  ;;  %268 = vmatmul.mubr.bf16.vlgmr.msra.gmra.mrb[0].mxu1 %v561_v13 }
  0x26   :  { %519 = vmatprep.mubr.msk.bf16.mxu0 %vm178_vm0, %v558_v14  ;;  %523 = vmatprep.mubr.msk.bf16.mxu1 %vm178_vm0, %v567_v15 }
  0x2d   :  { %244 = vmatmul.mubr.bf16.gmra.mrb[4].mxu0 %v560_v16  ;;  %276 = vmatmul.mubr.bf16.gmra.mrb[4].mxu1 %v569_v17 }
  0x2e   :  { %520 = vmatprep.mubr.msk.bf16.mxu0 %vm178_vm0, %v564_v18  ;;  %524 = vmatprep.mubr.msk.bf16.mxu1 %vm178_vm0, %v573_v19 }
  0x35   :  { %252 = vmatmul.mubr.bf16.gmra.mrb[8].mxu0 %v566_v20  ;;  %284 = vmatmul.mubr.bf16.gmra.mrb[8].mxu1 %v575_v21 }
  0x36   :  { %521 = vmatprep.mubr.msk.bf16.mxu0 %vm178_vm0, %v570_v22  ;;  %525 = vmatprep.mubr.msk.bf16.mxu1 %vm178_vm0, %v576_v23 }
  0x3d   :  { %260 = vmatmul.mubr.bf16.gmra.mrb[12].mxu0 %v572_v24  ;;  %292 = vmatmul.mubr.bf16.gmra.mrb[12].mxu1 %v578_v25 }
  0xf8   :  { %v690_v26 = vpop.f32.mrb[0].mxu0  ;;  %v692_v27 = vpop.f32.mrb[0].mxu1 }
  0xf9   :  { %v239_v28 = vpop.f32.mrb[1].mxu0  ;;  %v271_v29 = vpop.f32.mrb[1].mxu1  ;;  %v303_v32 = vsel %vm302_vm1, %v690_v26, 0.0  ;;  %v318_v9 = vsel %vm302_vm1, %v692_v27, 0.0 }
  0xfa   :  { %v694_v30 = vpop.f32.mrb[2].mxu0  ;;  %v696_v31 = vpop.f32.mrb[2].mxu1 }
  0xfb   :  { %v304_v33 = vsel %vm302_vm1, %v694_v30, 0.0  ;;  %v242_v34 = vpop.f32.mrb[3].mxu0  ;;  %v274_v35 = vpop.f32.mrb[3].mxu1  ;;  %v320_v11 = vsel %vm302_vm1, %v696_v31, 0.0 }
  0xfc   :  { %v305_v36 = vadd.f32 %v304_v33, %v303_v32 }
 0x100   :  { %v245_v37 = vpop.f32.mrb[4].mxu0  ;;  %v702_v38 = vpop.f32.mrb[4].mxu1 }
 0x101   :  { %v306_v39 = vsel %vm302_vm1, %v245_v37, 0.0  ;;  %v247_v40 = vpop.f32.mrb[5].mxu0  ;;  %v279_v41 = vpop.f32.mrb[5].mxu1  ;;  %v322_v13 = vsel %vm302_vm1, %v702_v38, 0.0 }
 0x102   :  { %v307_v42 = vadd.f32 %v306_v39, %v305_v36  ;;  %v248_v43 = vpop.f32.mrb[6].mxu0  ;;  %v705_v44 = vpop.f32.mrb[6].mxu1 }
 0x103   :  { %v308_v45 = vsel %vm302_vm1, %v248_v43, 0.0  ;;  %v250_v46 = vpop.f32.mrb[7].mxu0  ;;  %v282_v47 = vpop.f32.mrb[7].mxu1  ;;  %v324_v15 = vsel %vm302_vm1, %v705_v44, 0.0 }
 0x104   :  { %v309_v48 = vadd.f32 %v308_v45, %v307_v42 }
 0x108   :  { %v253_v49 = vpop.f32.mrb[8].mxu0  ;;  %v285_v50 = vpop.f32.mrb[8].mxu1 }
 0x109   :  { %v310_v51 = vsel %vm302_vm1, %v253_v49, 0.0  ;;  %v255_v52 = vpop.f32.mrb[9].mxu0  ;;  %v287_v53 = vpop.f32.mrb[9].mxu1  ;;  %v326_v17 = vsel %vm302_vm1, %v285_v50, 0.0 }
 0x10a   :  { %v311_v54 = vadd.f32 %v310_v51, %v309_v48  ;;  %v256_v55 = vpop.f32.mrb[10].mxu0  ;;  %v288_v56 = vpop.f32.mrb[10].mxu1 }
 0x10b   :  { %v312_v57 = vsel %vm302_vm1, %v256_v55, 0.0  ;;  %v258_v58 = vpop.f32.mrb[11].mxu0  ;;  %v290_v59 = vpop.f32.mrb[11].mxu1  ;;  %v328_v19 = vsel %vm302_vm1, %v288_v56, 0.0 }
 0x10c   :  { %v313_v60 = vadd.f32 %v312_v57, %v311_v54 }
 0x110   :  { %v261_v61 = vpop.f32.mrb[12].mxu0  ;;  %v293_v62 = vpop.f32.mrb[12].mxu1 }
 0x111   :  { %v314_v63 = vsel %vm302_vm1, %v261_v61, 0.0  ;;  %v263_v0 = vpop.f32.mrb[13].mxu0  ;;  %v295_v1 = vpop.f32.mrb[13].mxu1  ;;  %v330_v20 = vsel %vm302_vm1, %v293_v62, 0.0 }
 0x112   :  { %v315_v2 = vadd.f32 %v314_v63, %v313_v60  ;;  %v264_v3 = vpop.f32.mrb[14].mxu0  ;;  %v296_v4 = vpop.f32.mrb[14].mxu1 }
 0x113   :  { %v316_v5 = vsel %vm302_vm1, %v264_v3, 0.0  ;;  %v266_v6 = vpop.f32.mrb[15].mxu0  ;;  %v298_v7 = vpop.f32.mrb[15].mxu1  ;;  %v332_v23 = vsel %vm302_vm1, %v296_v4, 0.0 }
 0x114   :  { %v317_v8 = vadd.f32 %v316_v5, %v315_v2 }
 0x116   :  { %v319_v10 = vadd.f32 %v318_v9, %v317_v8 }
 0x118   :  { %v321_v12 = vadd.f32 %v320_v11, %v319_v10 }
 0x11a   :  { %v323_v14 = vadd.f32 %v322_v13, %v321_v12 }
 0x11c   :  { %v325_v16 = vadd.f32 %v324_v15, %v323_v14 }
 0x11e   :  { %v327_v18 = vadd.f32 %v326_v17, %v325_v16 }
 0x120   :  { %v329_v21 = vadd.f32 %v328_v19, %v327_v18 }
 0x122   :  { %v331_v22 = vadd.f32 %v330_v20, %v329_v21 }
 0x124   :  { %v333_v24 = vadd.f32 %v332_v23, %v331_v22 }
 0x126   :  { %v334_v25 = vrot.slane %v333_v24, 4 }
 0x128   :  { %v335_v28 = vadd.f32 %v334_v25, %v333_v24 }
 0x12a   :  { %v336_v29 = vrot.slane %v335_v28, 2 }
 0x12c   :  { %v337_v32 = vadd.f32 %v336_v29, %v335_v28 }
 0x12e   :  { %v338_v33 = vrot.slane %v337_v32, 1 }
 0x130   :  { %v339_v34 = vadd.f32 %v338_v33, %v337_v32 }
 0x132   :  { %v341_v35 = vmul.f32 0.0078125, %v339_v34 }
 0x134   :  { %v725_v36 = vsub.f32 %v690_v26, %v341_v35  ;;  %v728_v39 = vsub.f32 %v694_v30, %v341_v35  ;;  %v730_v40 = vsub.f32 %v245_v37, %v341_v35  ;;  %v732_v41 = vsub.f32 %v248_v43, %v341_v35 }
 0x135   :  { %v734_v42 = vsub.f32 %v253_v49, %v341_v35  ;;  %v736_v45 = vsub.f32 %v256_v55, %v341_v35  ;;  %v738_v46 = vsub.f32 %v261_v61, %v341_v35  ;;  %v740_v47 = vsub.f32 %v264_v3, %v341_v35 }
 0x136   :  { %v743_v48 = vsub.f32 %v692_v27, %v341_v35  ;;  %v746_v26 = vsub.f32 %v696_v31, %v341_v35  ;;  %v749_v30 = vsub.f32 %v702_v38, %v341_v35  ;;  %v752_v37 = vsub.f32 %v705_v44, %v341_v35 }
 0x137   :  { %v754_v43 = vsub.f32 %v285_v50, %v341_v35  ;;  %v756_v49 = vsub.f32 %v288_v56, %v341_v35  ;;  %v758_v51 = vsub.f32 %v293_v62, %v341_v35  ;;  %v760_v52 = vsub.f32 %v296_v4, %v341_v35 }
 0x138   :  { %v358_v27 = vmul.f32 %v725_v36, %v725_v36  ;;  %v359_v31 = vmul.f32 %v728_v39, %v728_v39  ;;  %v360_v38 = vmul.f32 %v730_v40, %v730_v40  ;;  %v361_v44 = vmul.f32 %v732_v41, %v732_v41 }
 0x139   :  { %v362_v55 = vmul.f32 %v734_v42, %v734_v42  ;;  %v363_v58 = vmul.f32 %v736_v45, %v736_v45  ;;  %v364_v61 = vmul.f32 %v738_v46, %v738_v46  ;;  %v365_v0 = vmul.f32 %v740_v47, %v740_v47 }
 0x13a   :  { %v374_v50 = vsel %vm302_vm1, %v358_v27, 0.0  ;;  %v375_v53 = vsel %vm302_vm1, %v359_v31, 0.0  ;;  %v377_v56 = vsel %vm302_vm1, %v360_v38, 0.0  ;;  %v379_v59 = vsel %vm302_vm1, %v361_v44, 0.0 }
 0x13b   :  { %v376_v54 = vadd.f32 %v375_v53, %v374_v50  ;;  %v381_v62 = vsel %vm302_vm1, %v362_v55, 0.0  ;;  %v383_v1 = vsel %vm302_vm1, %v363_v58, 0.0  ;;  %v366_v3 = vmul.f32 %v743_v48, %v743_v48 }
 0x13c   :  { %v385_v4 = vsel %vm302_vm1, %v364_v61, 0.0  ;;  %v367_v6 = vmul.f32 %v746_v26, %v746_v26  ;;  %v387_v7 = vsel %vm302_vm1, %v365_v0, 0.0  ;;  %v368_v9 = vmul.f32 %v749_v30, %v749_v30 }
 0x13d   :  { %v378_v57 = vadd.f32 %v377_v56, %v376_v54  ;;  %v389_v10 = vsel %vm302_vm1, %v366_v3, 0.0  ;;  %v369_v12 = vmul.f32 %v752_v37, %v752_v37  ;;  %v370_v15 = vmul.f32 %v754_v43, %v754_v43 }
 0x13e   :  { %v391_v13 = vsel %vm302_vm1, %v367_v6, 0.0  ;;  %v393_v16 = vsel %vm302_vm1, %v368_v9, 0.0  ;;  %v371_v18 = vmul.f32 %v756_v49, %v756_v49  ;;  %v372_v21 = vmul.f32 %v758_v51, %v758_v51 }
 0x13f   :  { %v380_v60 = vadd.f32 %v379_v59, %v378_v57  ;;  %v395_v19 = vsel %vm302_vm1, %v369_v12, 0.0  ;;  %v397_v22 = vsel %vm302_vm1, %v370_v15, 0.0  ;;  %v373_v24 = vmul.f32 %v760_v52, %v760_v52  ;;  %v300_v57 = vld [vmem:[%s898_s2] sm:$0x1] }
 0x140   :  { %v399_v25 = vsel %vm302_vm1, %v371_v18, 0.0  ;;  %v401_v29 = vsel %vm302_vm1, %v372_v21, 0.0  ;;  %v415_v55 = vlaneseq }
 0x141   :  { %v382_v63 = vadd.f32 %v381_v62, %v380_v60  ;;  %v403_v33 = vsel %vm302_vm1, %v373_v24, 0.0 }
 0x142   :  { %v416_v56 = vshrl.u32 %v415_v55, 7 }
 0x143   :  { %v384_v2 = vadd.f32 %v383_v1, %v382_v63 }
 0x144   :  { %v417_v58 = vsub.s32 0, %v416_v56 }
 0x145   :  { %v386_v5 = vadd.f32 %v385_v4, %v384_v2  ;;  %v526_v2 = vld [vmem:[%s899_s3] ss:$0 sm:$0xff] }
 0x147   :  { %v388_v8 = vadd.f32 %v387_v7, %v386_v5 }
 0x149   :  { %v390_v11 = vadd.f32 %v389_v10, %v388_v8 }
 0x14b   :  { %v392_v14 = vadd.f32 %v391_v13, %v390_v11 }
 0x14d   :  { %v394_v17 = vadd.f32 %v393_v16, %v392_v14 }
 0x14f   :  { %v396_v20 = vadd.f32 %v395_v19, %v394_v17 }
 0x151   :  { %v398_v23 = vadd.f32 %v397_v22, %v396_v20 }
 0x153   :  { %v400_v28 = vadd.f32 %v399_v25, %v398_v23 }
 0x155   :  { %v402_v32 = vadd.f32 %v401_v29, %v400_v28 }
 0x157   :  { %v404_v34 = vadd.f32 %v403_v33, %v402_v32 }
 0x159   :  { %v405_v35 = vrot.slane %v404_v34, 4 }
 0x15b   :  { %v406_v27 = vadd.f32 %v405_v35, %v404_v34 }
 0x15d   :  { %v407_v31 = vrot.slane %v406_v27, 2 }
 0x15f   :  { %v408_v38 = vadd.f32 %v407_v31, %v406_v27 }
 0x161   :  { %v409_v44 = vrot.slane %v408_v38, 1 }
 0x163   :  { %v410_v50 = vadd.f32 %v409_v44, %v408_v38 }
 0x165   :  { %v411_v53 = vmul.f32 0.0078125, %v410_v50 }
 0x167   :  { %v412_v54 = vadd.f32 1e-05, %v411_v53 }
 0x169   :  { %579 = vrsqrt.f32 %v412_v54 }
 0x173   :  { %v580_v59 = vpop.eup %579 }
 0x174   :  { %v414_v60 = vmul.f32 %v580_v59, %v300_v57 }
 0x176   :  { %v418_v61 = vrot.slane %v414_v60, %v417_v58 }
 0x178   :  { %v419_v62 = vmul.f32 %v418_v61, %v725_v36  ;;  %v420_v63 = vmul.f32 %v418_v61, %v728_v39  ;;  %v421_v0 = vmul.f32 %v418_v61, %v730_v40  ;;  %v422_v1 = vmul.f32 %v418_v61, %v732_v41 }
 0x179   :  { %v423_v3 = vmul.f32 %v418_v61, %v734_v42  ;;  %v424_v4 = vmul.f32 %v418_v61, %v736_v45  ;;  %v425_v5 = vmul.f32 %v418_v61, %v738_v46  ;;  %v426_v6 = vmul.f32 %v418_v61, %v740_v47 }
 0x17a   :  { %v427_v36 = vmul.f32 %v418_v61, %v743_v48  ;;  %v428_v39 = vmul.f32 %v418_v61, %v746_v26  ;;  %v429_v40 = vmul.f32 %v418_v61, %v749_v30  ;;  %v430_v41 = vmul.f32 %v418_v61, %v752_v37 }
 0x17b   :  { %v431_v7 = vmul.f32 %v418_v61, %v754_v43  ;;  %v432_v8 = vmul.f32 %v418_v61, %v756_v49  ;;  %v433_v42 = vmul.f32 %v418_v61, %v758_v51  ;;  %v434_v45 = vmul.f32 %v418_v61, %v760_v52 }
 0x17c   :  { %v441_v9 = vadd.f32 %v526_v2, %v419_v62  ;;  %v442_v46 = vadd.f32 %v526_v2, %v420_v63  ;;  %v443_v10 = vadd.f32 %v526_v2, %v421_v0  ;;  %v444_v47 = vadd.f32 %v526_v2, %v422_v1 }
 0x17d   :  { %v445_v11 = vadd.f32 %v526_v2, %v423_v3  ;;  %v446_v48 = vadd.f32 %v526_v2, %v424_v4  ;;  %v447_v12 = vadd.f32 %v526_v2, %v425_v5  ;;  %v448_v26 = vadd.f32 %v526_v2, %v426_v6 }
 0x17e   :  { %v449_v13 = vadd.f32 %v526_v2, %v427_v36  ;;  %v450_v30 = vadd.f32 %v526_v2, %v428_v39  ;;  %v451_v14 = vadd.f32 %v526_v2, %v429_v40  ;;  %v452_v37 = vadd.f32 %v526_v2, %v430_v41 }
 0x17f   :  { %v453_v15 = vadd.f32 %v526_v2, %v431_v7  ;;  %v454_v43 = vadd.f32 %v526_v2, %v432_v8  ;;  %v455_v16 = vadd.f32 %v526_v2, %v433_v42  ;;  %v456_v49 = vadd.f32 %v526_v2, %v434_v45 }
 0x180   :  { %v457_v17 = vmax.f32 %v441_v9, 0.0  ;;  %v458_v51 = vmax.f32 %v442_v46, 0.0  ;;  %v459_v18 = vmax.f32 %v443_v10, 0.0  ;;  %v460_v52 = vmax.f32 %v444_v47, 0.0 }
 0x181   :  { %v461_v19 = vmax.f32 %v445_v11, 0.0  ;;  %v462_v20 = vmax.f32 %v446_v48, 0.0  ;;  %v463_v21 = vmax.f32 %v447_v12, 0.0  ;;  %v464_v22 = vmax.f32 %v448_v26, 0.0 }
 0x182   :  { %v465_v23 = vmax.f32 %v449_v13, 0.0  ;;  %v466_v24 = vmax.f32 %v450_v30, 0.0  ;;  %v467_v25 = vmax.f32 %v451_v14, 0.0  ;;  %v468_v28 = vmax.f32 %v452_v37, 0.0  ;;  %473 = vst.msk [vmem:[%s900_s4] sm:$0xff] %vm302_vm1, %v457_v17  ;;  %474 = vst.msk [vmem:[%s900_s4 + $0x8] sm:$0xff] %vm302_vm1, %v458_v51 }
 0x183   :  { %475 = vst.msk [vmem:[%s900_s4 + $0x10] sm:$0xff] %vm302_vm1, %v459_v18  ;;  %476 = vst.msk [vmem:[%s900_s4 + $0x18] sm:$0xff] %vm302_vm1, %v460_v52  ;;  %v469_v29 = vmax.f32 %v453_v15, 0.0  ;;  %v470_v32 = vmax.f32 %v454_v43, 0.0  ;;  %v471_v33 = vmax.f32 %v455_v16, 0.0  ;;  %v472_v34 = vmax.f32 %v456_v49, 0.0 }
 0x184   :  { %477 = vst.msk [vmem:[%s900_s4 + $0x20] sm:$0xff] %vm302_vm1, %v461_v19  ;;  %478 = vst.msk [vmem:[%s900_s4 + $0x28] sm:$0xff] %vm302_vm1, %v462_v20 }
 0x185   :  { %479 = vst.msk [vmem:[%s900_s4 + $0x30] sm:$0xff] %vm302_vm1, %v463_v21  ;;  %480 = vst.msk [vmem:[%s900_s4 + $0x38] sm:$0xff] %vm302_vm1, %v464_v22 }
 0x186   :  { %481 = vst.msk [vmem:[%s900_s4 + $0x40] sm:$0xff] %vm302_vm1, %v465_v23  ;;  %482 = vst.msk [vmem:[%s900_s4 + $0x48] sm:$0xff] %vm302_vm1, %v466_v24 }
 0x187   :  { %483 = vst.msk [vmem:[%s900_s4 + $0x50] sm:$0xff] %vm302_vm1, %v467_v25  ;;  %484 = vst.msk [vmem:[%s900_s4 + $0x58] sm:$0xff] %vm302_vm1, %v468_v28 }
 0x188   :  { %485 = vst.msk [vmem:[%s900_s4 + $0x60] sm:$0xff] %vm302_vm1, %v469_v29  ;;  %486 = vst.msk [vmem:[%s900_s4 + $0x68] sm:$0xff] %vm302_vm1, %v470_v32 }
 0x189   :  { %487 = vst.msk [vmem:[%s900_s4 + $0x70] sm:$0xff] %vm302_vm1, %v471_v33  ;;  %488 = vst.msk [vmem:[%s900_s4 + $0x78] sm:$0xff] %vm302_vm1, %v472_v34 }

// kernel: simple_block_forward.3
= control target key start
LH: loop header
LB: loop body
LE: loop exit
PB: predicated region body
PF: predicated region fallthrough
CT: control target
= control target key end

     0   :  { %vm327_vm0 = vcmask 261120   ;;  %vm766_vm1 = vcmask 130048   ;;  %s2024_s0 = inlined_call_operand.vmem [shape: bf16[128,288], index: 0, kind: input, shape index: {}]   ;;  %s2025_s1 = inlined_call_operand.vmem [shape: bf16[288,32], index: 1, kind: input, shape index: {}]   ;;  %s2026_s2 = inlined_call_operand.vmem [shape: f32[1,32], index: 2, kind: input, shape index: {}]   ;;  %s2027_s3 = inlined_call_operand.vmem [shape: f32[1,32], index: 3, kind: input, shape index: {}]   ;;  %s2028_s4 = inlined_call_operand.vmem [shape: bf16[128,16], index: 4, kind: input, shape index: {}]   ;;  %s2029_s5 = inlined_call_operand.vmem [shape: bf16[16,32], index: 5, kind: input, shape index: {}]   ;;  %s2030_s6 = inlined_call_operand.vmem [shape: f32[1,32], index: 6, kind: input, shape index: {}]   ;;  %s2031_s7 = inlined_call_operand.vmem [shape: f32[1,32], index: 7, kind: input, shape index: {}]   ;;  %s2032_s8 = inlined_call_operand.hbm [shape: f32[128,32], index: 8, kind: output, shape index: {}]  }
   0x1   :  { %v1300_v0 = vld [vmem:[%s2025_s1 + $0x40] sm:$0xff]   ;;  %v1303_v3 = vld [vmem:[%s2025_s1 + $0x48] sm:$0xff]   ;;  %v1307_v7 = vld [vmem:[%s2025_s1 + $0x50] sm:$0xff]  }
   0x2   :  { %v1301_v1 = vld [vmem:[%s2025_s1 + $0x80] sm:$0xff]   ;;  %1176 = vmatprep.subr.bf16.mxu0 %v1300_v0  ;;  %v1304_v4 = vld [vmem:[%s2025_s1 + $0x88] sm:$0xff]   ;;  %v1309_v9 = vld [vmem:[%s2025_s1 + $0x10] sm:$0xff]  }
   0x3   :  { %v1302_v2 = vld [vmem:[%s2025_s1] sm:$0xff]   ;;  %1259 = vmatprep.subr.bf16.mxu1 %v1301_v1  ;;  %v1305_v5 = vld [vmem:[%s2025_s1 + $0x8] sm:$0xff]   ;;  %v1310_v10 = vld [vmem:[%s2025_s1 + $0x58] sm:$0xff]  }
   0x4   :  { %1177 = vmatpush3.bf16.msra.mxu0 %v1302_v2  ;;  %1260 = vmatpush3.bf16.msra.mxu1 %v1301_v1  ;;  %v1306_v6 = vld [vmem:[%s2024_s0 + $0x8] ss:$12 sps:$4 sm:$0xff]   ;;  %v1308_v8 = vld [vmem:[%s2024_s0 + $0x20] ss:$12 sps:$4 sm:$0xff]   ;;  %v1311_v11 = vld [vmem:[%s2025_s1 + $0x18] sm:$0xff]  }
   0x5   :  { %1178 = vmatprep.subr.bf16.mxu0 %v1303_v3  ;;  %1261 = vmatprep.subr.bf16.mxu1 %v1304_v4  ;;  %v1312_v12 = vld [vmem:[%s2024_s0 + $0x38] ss:$12 sps:$4 sm:$0xff]   ;;  %v1314_v14 = vld [vmem:[%s2024_s0 + $0x50] ss:$12 sps:$4 sm:$0xff]   ;;  %v1316_v16 = vld [vmem:[%s2025_s1 + $0x68] sm:$0xff]  }
   0x6   :  { %1263 = vmatprep.mubr.msk.bf16.mxu1 %vm327_vm0, %v1306_v6  ;;  %v1313_v13 = vld [vmem:[%s2025_s1 + $0x60] sm:$0xff]   ;;  %v1318_v17 = vld [vmem:[%s2024_s0 + $0x68] ss:$12 sps:$4 sm:$0xff]   ;;  %v1322_v22 = vld [vmem:[%s2025_s1 + $0x78] sm:$0xff]  }
   0x7   :  { %v1315_v15 = vld [vmem:[%s2025_s1 + $0x20] sm:$0xff]   ;;  %v1317_v18 = vld [vmem:[%s2025_s1 + $0x28] sm:$0xff]   ;;  %v1319_v19 = vld [vmem:[%s2025_s1 + $0x70] sm:$0xff]  }
   0x8   :  { %1179 = vmatpush3.bf16.msra.mxu0 %v1305_v5  ;;  %1262 = vmatpush3.bf16.msra.mxu1 %v1304_v4  ;;  %v1320_v20 = vld [vmem:[%s2024_s0 + $0x80] ss:$12 sps:$4 sm:$0xff]   ;;  %v1321_v21 = vld [vmem:[%s2025_s1 + $0x30] sm:$0xff]   ;;  %v1327_v24 = vld [vmem:[%s2024_s0 + $0x98] ss:$12 sps:$4 sm:$0xff]  }
   0x9   :  { %1180 = vmatprep.subr.bf16.mxu0 %v1307_v7  ;;  %v1326_v23 = vld [vmem:[%s2024_s0 + $0x4] ss:$12 sps:$4 sm:$0xff]   ;;  %v1323_v26 = vld [vmem:[%s2025_s1 + $0x38] sm:$0xff]   ;;  %v1324_v27 = vld [vmem:[%s2024_s0] ss:$12 sps:$4 sm:$0xff]  }
   0xa   :  { %384 = vmatprep.mubr.bf16.mxu0 %v1326_v23  ;;  %v1328_v25 = vld [vmem:[%s2029_s5] sm:$0xff]   ;;  %v1329_v28 = vld [vmem:[%s2024_s0 + $0xb0] ss:$12 sps:$4 sm:$0xff]   ;;  %v1334_v32 = vld [vmem:[%s2028_s4 + $0x8] sm:$0xff]  }
   0xb   :  { %1264 = vmatmul.mubr.msk.bf16.vlgmr.msra.gmra.mrb[0].mxu1 %vm327_vm0, %v1308_v8  ;;  %1279 = vmatprep.subr.bf16.mxu1 %v1328_v25  ;;  %v1330_v29 = vld [vmem:[%s2024_s0 + $0x1c] ss:$12 sps:$4 sm:$0xff]   ;;  %v1332_v30 = vld [vmem:[%s2028_s4] sm:$0xff]   ;;  %v1337_v34 = vld [vmem:[%s2028_s4 + $0x10] sm:$0xff]  }
   0xc   :  { %1181 = vmatpush3.bf16.msra.mxu0 %v1309_v9  ;;  %1267 = vmatprep.mubr.msk.bf16.mxu1 %vm327_vm0, %v1312_v12  ;;  %v1333_v31 = vld [vmem:[%s2024_s0 + $0x18] ss:$12 sps:$4 sm:$0xff]   ;;  %v1335_v33 = vld [vmem:[%s2024_s0 + $0x34] ss:$12 sps:$4 sm:$0xff]  }
   0xd   :  { %1182 = vmatprep.subr.bf16.mxu0 %v1310_v10  ;;  %1280 = vmatpush3.bf16.msra.mxu1 %v1328_v25 }
  0x10   :  { %1183 = vmatpush3.bf16.msra.mxu0 %v1311_v11 }
  0x11   :  { %1184 = vmatprep.subr.bf16.mxu0 %v1313_v13 }
  0x13   :  { %1268 = vmatmul.mubr.msk.bf16.gmra.mrb[4].mxu1 %vm327_vm0, %v1314_v14 }
  0x14   :  { %1185 = vmatpush3.bf16.msra.mxu0 %v1315_v15  ;;  %1271 = vmatprep.mubr.msk.bf16.mxu1 %vm327_vm0, %v1318_v17 }
  0x15   :  { %1186 = vmatprep.subr.bf16.mxu0 %v1316_v16 }
  0x18   :  { %1187 = vmatpush3.bf16.msra.mxu0 %v1317_v18 }
  0x19   :  { %1188 = vmatprep.subr.bf16.mxu0 %v1319_v19 }
  0x1b   :  { %1272 = vmatmul.mubr.msk.bf16.gmra.mrb[8].mxu1 %vm327_vm0, %v1320_v20 }
  0x1c   :  { %1189 = vmatpush3.bf16.msra.mxu0 %v1321_v21  ;;  %1275 = vmatprep.mubr.msk.bf16.mxu1 %vm327_vm0, %v1327_v24 }
  0x1d   :  { %1190 = vmatprep.subr.bf16.mxu0 %v1322_v22 }
  0x20   :  { %1191 = vmatpush3.bf16.msra.mxu0 %v1323_v26 }
  0x23   :  { %385 = vmatmul.mubr.bf16.vlgmr.msra.gmra.mrb[0].mxu0 %v1324_v27  ;;  %1276 = vmatmul.mubr.msk.bf16.gmra.mrb[12].mxu1 %vm327_vm0, %v1329_v28 }
  0x24   :  { %392 = vmatprep.mubr.bf16.mxu0 %v1330_v29  ;;  %1281 = vmatprep.mubr.msk.bf16.mxu1 %vm766_vm1, %v1332_v30 }
  0x2b   :  { %393 = vmatmul.mubr.bf16.gmra.mrb[4].mxu0 %v1333_v31  ;;  %1282 = vmatmul.mubr.msk.bf16.vlgmr.msra.gmra.mrb[16].mxu1 %vm766_vm1, %v1334_v32 }
  0x2c   :  { %400 = vmatprep.mubr.bf16.mxu0 %v1335_v33  ;;  %1285 = vmatprep.mubr.msk.bf16.mxu1 %vm766_vm1, %v1337_v34 }
  0x2d   :  { %13 = vsyncpa [#allocation3], 0  ;;  %v1338_v35 = vld [vmem:[%s2024_s0 + $0x30] ss:$12 sps:$4 sm:$0xff]   ;;  %v1340_v37 = vld [vmem:[%s2024_s0 + $0x4c] ss:$12 sps:$4 sm:$0xff]  }
  0x2e   :  { %v1339_v36 = vld [vmem:[%s2028_s4 + $0x18] sm:$0xff]   ;;  %v1342_v38 = vld [vmem:[%s2028_s4 + $0x20] sm:$0xff]   ;;  %v1343_v39 = vld [vmem:[%s2024_s0 + $0x48] ss:$12 sps:$4 sm:$0xff]  }
  0x2f   :  { %v1344_v40 = vld [vmem:[%s2028_s4 + $0x28] sm:$0xff]   ;;  %v1345_v41 = vld [vmem:[%s2024_s0 + $0x64] ss:$12 sps:$4 sm:$0xff]   ;;  %v1349_v44 = vld [vmem:[%s2028_s4 + $0x38] sm:$0xff]  }
  0x30   :  { %v1347_v42 = vld [vmem:[%s2028_s4 + $0x30] sm:$0xff]   ;;  %v1348_v43 = vld [vmem:[%s2024_s0 + $0x60] ss:$12 sps:$4 sm:$0xff]   ;;  %v1350_v45 = vld [vmem:[%s2024_s0 + $0x7c] ss:$12 sps:$4 sm:$0xff]  }
  0x31   :  { %v1352_v46 = vld [vmem:[%s2024_s0 + $0x78] ss:$12 sps:$4 sm:$0xff]   ;;  %v1353_v47 = vld [vmem:[%s2024_s0 + $0x94] ss:$12 sps:$4 sm:$0xff]   ;;  %v1355_v48 = vld [vmem:[%s2024_s0 + $0x90] ss:$12 sps:$4 sm:$0xff]  }
  0x32   :  { %v1356_v49 = vld [vmem:[%s2024_s0 + $0xac] ss:$12 sps:$4 sm:$0xff]   ;;  %v1358_v50 = vld [vmem:[%s2024_s0 + $0xa8] ss:$12 sps:$4 sm:$0xff]  }
  0x33   :  { %401 = vmatmul.mubr.bf16.gmra.mrb[8].mxu0 %v1338_v35  ;;  %1286 = vmatmul.mubr.msk.bf16.gmra.mrb[20].mxu1 %vm766_vm1, %v1339_v36 }
  0x34   :  { %408 = vmatprep.mubr.bf16.mxu0 %v1340_v37  ;;  %1289 = vmatprep.mubr.msk.bf16.mxu1 %vm766_vm1, %v1342_v38 }
  0x3b   :  { %409 = vmatmul.mubr.bf16.gmra.mrb[12].mxu0 %v1343_v39  ;;  %1290 = vmatmul.mubr.msk.bf16.gmra.mrb[24].mxu1 %vm766_vm1, %v1344_v40 }
  0x3c   :  { %416 = vmatprep.mubr.bf16.mxu0 %v1345_v41  ;;  %1293 = vmatprep.mubr.msk.bf16.mxu1 %vm766_vm1, %v1347_v42 }
  0x43   :  { %417 = vmatmul.mubr.bf16.gmra.mrb[16].mxu0 %v1348_v43  ;;  %1294 = vmatmul.mubr.msk.bf16.gmra.mrb[28].mxu1 %vm766_vm1, %v1349_v44 }
  0x44   :  { %424 = vmatprep.mubr.bf16.mxu0 %v1350_v45 }
  0x4b   :  { %425 = vmatmul.mubr.bf16.gmra.mrb[20].mxu0 %v1352_v46 }
  0x4c   :  { %432 = vmatprep.mubr.bf16.mxu0 %v1353_v47 }
  0x53   :  { %433 = vmatmul.mubr.bf16.gmra.mrb[24].mxu0 %v1355_v48 }
  0x54   :  { %440 = vmatprep.mubr.bf16.mxu0 %v1356_v49 }
  0x5b   :  { %441 = vmatmul.mubr.bf16.gmra.mrb[28].mxu0 %v1358_v50 }
  0xde   :  { %v1265_v51 = vpop.f32.mrb[0].mxu1 }
  0xdf   :  { %v483_v52 = vpop.f32.mrb[1].mxu1 }
  0xe0   :  { %v1266_v53 = vpop.f32.mrb[2].mxu1 }
  0xe1   :  { %v486_v54 = vpop.f32.mrb[3].mxu1 }
  0xe6   :  { %v1604_v55 = vpop.f32.mrb[4].mxu1 }
  0xe7   :  { %v499_v56 = vpop.f32.mrb[5].mxu1 }
  0xe8   :  { %v1606_v57 = vpop.f32.mrb[6].mxu1 }
  0xe9   :  { %v502_v58 = vpop.f32.mrb[7].mxu1 }
  0xee   :  { %v1608_v59 = vpop.f32.mrb[8].mxu1 }
  0xef   :  { %v1610_v60 = vpop.f32.mrb[9].mxu1 }
  0xf0   :  { %v1612_v61 = vpop.f32.mrb[10].mxu1 }
  0xf1   :  { %v1614_v62 = vpop.f32.mrb[11].mxu1 }
  0xf6   :  { %v1192_v63 = vpop.f32.mrb[0].mxu0  ;;  %v1616_v0 = vpop.f32.mrb[12].mxu1 }
  0xf7   :  { %v1193_v1 = vpop.f32.mrb[1].mxu0  ;;  %v1618_v2 = vpop.f32.mrb[13].mxu1 }
  0xf8   :  { %v1194_v3 = vadd.f32 %v1193_v1, %v1192_v63  ;;  %v1195_v4 = vpop.f32.mrb[2].mxu0  ;;  %v1620_v5 = vpop.f32.mrb[14].mxu1 }
  0xf9   :  { %v1196_v6 = vpop.f32.mrb[3].mxu0  ;;  %v1622_v7 = vpop.f32.mrb[15].mxu1 }
  0xfa   :  { %v1624_v8 = vadd.f32 %v1194_v3, %v483_v52  ;;  %v1197_v9 = vadd.f32 %v1196_v6, %v1195_v4 }
  0xfc   :  { %v1626_v10 = vadd.f32 %v1197_v9, %v486_v54  ;;  %v548_v11 = vsel %vm327_vm0, %v1624_v8, 0.0 }
  0xfe   :  { %v549_v12 = vsel %vm327_vm0, %v1626_v10, 0.0  ;;  %v1198_v13 = vpop.f32.mrb[4].mxu0  ;;  %v1632_v14 = vpop.f32.mrb[16].mxu1 }
  0xff   :  { %v550_v15 = vadd.f32 %v549_v12, %v548_v11  ;;  %v1199_v16 = vpop.f32.mrb[5].mxu0  ;;  %v1634_v17 = vpop.f32.mrb[17].mxu1  ;;  %v893_v24 = vsel %vm327_vm0, %v1632_v14, 0.0 }
 0x100   :  { %v1200_v18 = vadd.f32 %v1199_v16, %v1198_v13  ;;  %v890_v19 = vsel %vm327_vm0, %v1634_v17, 0.0  ;;  %v1201_v20 = vpop.f32.mrb[6].mxu0  ;;  %v1638_v21 = vpop.f32.mrb[18].mxu1 }
 0x101   :  { %v1202_v22 = vpop.f32.mrb[7].mxu0  ;;  %v1640_v23 = vpop.f32.mrb[19].mxu1  ;;  %v895_v30 = vsel %vm327_vm0, %v1638_v21, 0.0 }
 0x102   :  { %v1644_v25 = vadd.f32 %v1265_v51, %v1200_v18  ;;  %v1203_v26 = vadd.f32 %v1202_v22, %v1201_v20  ;;  %v891_v27 = vsel %vm327_vm0, %v1640_v23, 0.0 }
 0x103   :  { %v892_v28 = vadd.f32 %v891_v27, %v890_v19 }
 0x104   :  { %v551_v29 = vsel %vm327_vm0, %v1644_v25, 0.0  ;;  %v1652_v31 = vadd.f32 %v1266_v53, %v1203_v26 }
 0x105   :  { %v552_v32 = vadd.f32 %v551_v29, %v550_v15  ;;  %v894_v33 = vadd.f32 %v893_v24, %v892_v28 }
 0x106   :  { %v553_v34 = vsel %vm327_vm0, %v1652_v31, 0.0  ;;  %v1204_v35 = vpop.f32.mrb[8].mxu0  ;;  %v1656_v36 = vpop.f32.mrb[20].mxu1 }
 0x107   :  { %v554_v37 = vadd.f32 %v553_v34, %v552_v32  ;;  %v1205_v38 = vpop.f32.mrb[9].mxu0  ;;  %v1658_v39 = vpop.f32.mrb[21].mxu1  ;;  %v896_v40 = vadd.f32 %v895_v30, %v894_v33  ;;  %v901_v48 = vsel %vm327_vm0, %v1656_v36, 0.0 }
 0x108   :  { %v1206_v41 = vadd.f32 %v1205_v38, %v1204_v35  ;;  %v897_v42 = vsel %vm327_vm0, %v1658_v39, 0.0  ;;  %v1207_v43 = vpop.f32.mrb[10].mxu0  ;;  %v1662_v44 = vpop.f32.mrb[22].mxu1 }
 0x109   :  { %v898_v45 = vadd.f32 %v897_v42, %v896_v40  ;;  %v1208_v46 = vpop.f32.mrb[11].mxu0  ;;  %v1664_v47 = vpop.f32.mrb[23].mxu1  ;;  %v903_v54 = vsel %vm327_vm0, %v1662_v44, 0.0 }
 0x10a   :  { %v1668_v49 = vadd.f32 %v1206_v41, %v499_v56  ;;  %v1209_v50 = vadd.f32 %v1208_v46, %v1207_v43  ;;  %v899_v51 = vsel %vm327_vm0, %v1664_v47, 0.0 }
 0x10b   :  { %v900_v52 = vadd.f32 %v899_v51, %v898_v45 }
 0x10c   :  { %v555_v53 = vsel %vm327_vm0, %v1668_v49, 0.0  ;;  %v1676_v63 = vadd.f32 %v1209_v50, %v502_v58 }
 0x10d   :  { %v556_v1 = vadd.f32 %v555_v53, %v554_v37  ;;  %v902_v3 = vadd.f32 %v901_v48, %v900_v52 }
 0x10e   :  { %v557_v4 = vsel %vm327_vm0, %v1676_v63, 0.0  ;;  %v1210_v56 = vpop.f32.mrb[12].mxu0  ;;  %v1680_v6 = vpop.f32.mrb[24].mxu1 }
 0x10f   :  { %v558_v9 = vadd.f32 %v557_v4, %v556_v1  ;;  %v1211_v11 = vpop.f32.mrb[13].mxu0  ;;  %v1682_v12 = vpop.f32.mrb[25].mxu1  ;;  %v904_v13 = vadd.f32 %v903_v54, %v902_v3  ;;  %v909_v24 = vsel %vm327_vm0, %v1680_v6, 0.0 }
 0x110   :  { %v1212_v15 = vadd.f32 %v1211_v11, %v1210_v56  ;;  %v905_v16 = vsel %vm327_vm0, %v1682_v12, 0.0  ;;  %v1213_v18 = vpop.f32.mrb[14].mxu0  ;;  %v1686_v58 = vpop.f32.mrb[26].mxu1 }
 0x111   :  { %v906_v19 = vadd.f32 %v905_v16, %v904_v13  ;;  %v1214_v20 = vpop.f32.mrb[15].mxu0  ;;  %v1688_v22 = vpop.f32.mrb[27].mxu1  ;;  %v911_v32 = vsel %vm327_vm0, %v1686_v58, 0.0 }
 0x112   :  { %v1693_v26 = vadd.f32 %v1604_v55, %v1212_v15  ;;  %v1215_v27 = vadd.f32 %v1214_v20, %v1213_v18  ;;  %v907_v28 = vsel %vm327_vm0, %v1688_v22, 0.0 }
 0x113   :  { %v908_v29 = vadd.f32 %v907_v28, %v906_v19 }
 0x114   :  { %v559_v30 = vsel %vm327_vm0, %v1693_v26, 0.0  ;;  %v1702_v33 = vadd.f32 %v1606_v57, %v1215_v27 }
 0x115   :  { %v560_v34 = vadd.f32 %v559_v30, %v558_v9  ;;  %v910_v35 = vadd.f32 %v909_v24, %v908_v29 }
 0x116   :  { %v561_v55 = vsel %vm327_vm0, %v1702_v33, 0.0  ;;  %v1216_v37 = vpop.f32.mrb[16].mxu0  ;;  %v1706_v38 = vpop.f32.mrb[28].mxu1 }
 0x117   :  { %v562_v40 = vadd.f32 %v561_v55, %v560_v34  ;;  %v1217_v41 = vpop.f32.mrb[17].mxu0  ;;  %v1708_v42 = vpop.f32.mrb[29].mxu1  ;;  %v912_v43 = vadd.f32 %v911_v32, %v910_v35  ;;  %v917_v53 = vsel %vm327_vm0, %v1706_v38, 0.0 }
 0x118   :  { %v1218_v45 = vadd.f32 %v1217_v41, %v1216_v37  ;;  %v913_v46 = vsel %vm327_vm0, %v1708_v42, 0.0  ;;  %v1219_v48 = vpop.f32.mrb[18].mxu0  ;;  %v1712_v57 = vpop.f32.mrb[30].mxu1 }
 0x119   :  { %v914_v50 = vadd.f32 %v913_v46, %v912_v43  ;;  %v1220_v51 = vpop.f32.mrb[19].mxu0  ;;  %v876_v52 = vpop.f32.mrb[31].mxu1  ;;  %v919_v9 = vsel %vm327_vm0, %v1712_v57, 0.0 }
 0x11a   :  { %v1717_v54 = vadd.f32 %v1218_v45, %v1610_v60  ;;  %v1221_v1 = vadd.f32 %v1220_v51, %v1219_v48  ;;  %v915_v3 = vsel %vm327_vm0, %v876_v52, 0.0 }
 0x11b   :  { %v916_v4 = vadd.f32 %v915_v3, %v914_v50 }
 0x11c   :  { %v563_v56 = vsel %vm327_vm0, %v1717_v54, 0.0  ;;  %v1725_v11 = vadd.f32 %v1221_v1, %v1614_v62 }
 0x11d   :  { %v564_v13 = vadd.f32 %v563_v56, %v562_v40  ;;  %v918_v15 = vadd.f32 %v917_v53, %v916_v4 }
 0x11e   :  { %v565_v16 = vsel %vm327_vm0, %v1725_v11, 0.0  ;;  %v1222_v60 = vpop.f32.mrb[20].mxu0 }
 0x11f   :  { %v566_v18 = vadd.f32 %v565_v16, %v564_v13  ;;  %v920_v19 = vadd.f32 %v919_v9, %v918_v15  ;;  %v1223_v20 = vpop.f32.mrb[21].mxu0 }
 0x120   :  { %v1224_v24 = vadd.f32 %v1223_v20, %v1222_v60  ;;  %v1225_v27 = vpop.f32.mrb[22].mxu0 }
 0x121   :  { %v921_v28 = vrot.slane %v920_v19, 4  ;;  %v1226_v29 = vpop.f32.mrb[23].mxu0 }
 0x122   :  { %v1730_v30 = vadd.f32 %v1608_v59, %v1224_v24  ;;  %v1227_v32 = vadd.f32 %v1226_v29, %v1225_v27 }
 0x123   :  { %v922_v34 = vadd.f32 %v921_v28, %v920_v19 }
 0x124   :  { %v567_v62 = vsel %vm327_vm0, %v1730_v30, 0.0  ;;  %v1735_v35 = vadd.f32 %v1612_v61, %v1227_v32 }
 0x125   :  { %v923_v55 = vrot.slane %v922_v34, 2  ;;  %v568_v37 = vadd.f32 %v567_v62, %v566_v18 }
 0x126   :  { %v569_v40 = vsel %vm327_vm0, %v1735_v35, 0.0  ;;  %v1228_v41 = vpop.f32.mrb[24].mxu0 }
 0x127   :  { %v924_v43 = vadd.f32 %v923_v55, %v922_v34  ;;  %v570_v45 = vadd.f32 %v569_v40, %v568_v37  ;;  %v1229_v46 = vpop.f32.mrb[25].mxu0 }
 0x128   :  { %v1230_v48 = vadd.f32 %v1229_v46, %v1228_v41  ;;  %v1231_v59 = vpop.f32.mrb[26].mxu0 }
 0x129   :  { %v925_v50 = vrot.slane %v924_v43, 1  ;;  %v1232_v51 = vpop.f32.mrb[27].mxu0 }
 0x12a   :  { %v1740_v53 = vadd.f32 %v1230_v48, %v1618_v2  ;;  %v1233_v1 = vadd.f32 %v1232_v51, %v1231_v59 }
 0x12b   :  { %v926_v3 = vadd.f32 %v925_v50, %v924_v43 }
 0x12c   :  { %v571_v61 = vsel %vm327_vm0, %v1740_v53, 0.0  ;;  %v1745_v4 = vadd.f32 %v1233_v1, %v1622_v7 }
 0x12d   :  { %v927_v56 = vmul.f32 0.0078125, %v926_v3  ;;  %v572_v9 = vadd.f32 %v571_v61, %v570_v45 }
 0x12e   :  { %v1234_v13 = vpop.f32.mrb[28].mxu0 }
 0x12f   :  { %v1748_v15 = vsub.f32 %v1634_v17, %v927_v56  ;;  %v1751_v16 = vsub.f32 %v1640_v23, %v927_v56  ;;  %v1754_v2 = vsub.f32 %v1632_v14, %v927_v56  ;;  %v1757_v60 = vsub.f32 %v1638_v21, %v927_v56  ;;  %v1235_v18 = vpop.f32.mrb[29].mxu0 }
 0x130   :  { %v1760_v19 = vsub.f32 %v1658_v39, %v927_v56  ;;  %v1763_v7 = vsub.f32 %v1664_v47, %v927_v56  ;;  %v1766_v20 = vsub.f32 %v1656_v36, %v927_v56  ;;  %v1769_v17 = vsub.f32 %v1662_v44, %v927_v56  ;;  %v1237_v23 = vpop.f32.mrb[30].mxu0 }
 0x131   :  { %v1772_v14 = vsub.f32 %v1682_v12, %v927_v56  ;;  %v1775_v21 = vsub.f32 %v1688_v22, %v927_v56  ;;  %v1778_v24 = vsub.f32 %v1680_v6, %v927_v56  ;;  %v1781_v39 = vsub.f32 %v1686_v58, %v927_v56  ;;  %v1238_v47 = vpop.f32.mrb[31].mxu0 }
 0x132   :  { %v1784_v36 = vsub.f32 %v1708_v42, %v927_v56  ;;  %v1786_v27 = vsub.f32 %v876_v52, %v927_v56  ;;  %v1789_v44 = vsub.f32 %v1706_v38, %v927_v56  ;;  %v1792_v12 = vsub.f32 %v1712_v57, %v927_v56 }
 0x133   :  { %v944_v22 = vmul.f32 %v1748_v15, %v1748_v15  ;;  %v945_v6 = vmul.f32 %v1751_v16, %v1751_v16  ;;  %v946_v58 = vmul.f32 %v1754_v2, %v1754_v2  ;;  %v947_v42 = vmul.f32 %v1757_v60, %v1757_v60 }
 0x134   :  { %v573_v57 = vsel %vm327_vm0, %v1745_v4, 0.0  ;;  %v948_v29 = vmul.f32 %v1760_v19, %v1760_v19  ;;  %v949_v62 = vmul.f32 %v1763_v7, %v1763_v7  ;;  %v1236_v40 = vadd.f32 %v1235_v18, %v1234_v13 }
 0x135   :  { %v960_v52 = vsel %vm327_vm0, %v944_v22, 0.0  ;;  %v961_v38 = vsel %vm327_vm0, %v945_v6, 0.0  ;;  %v963_v32 = vsel %vm327_vm0, %v946_v58, 0.0  ;;  %v965_v55 = vsel %vm327_vm0, %v947_v42, 0.0 }
 0x136   :  { %v962_v28 = vadd.f32 %v961_v38, %v960_v52  ;;  %v574_v37 = vadd.f32 %v573_v57, %v572_v9  ;;  %v1239_v43 = vadd.f32 %v1238_v47, %v1237_v23  ;;  %v950_v45 = vmul.f32 %v1766_v20, %v1766_v20 }
 0x137   :  { %v967_v46 = vsel %vm327_vm0, %v948_v29, 0.0  ;;  %v540_v48 = vadd.f32 %v1616_v0, %v1236_v40  ;;  %v951_v51 = vmul.f32 %v1769_v17, %v1769_v17  ;;  %v969_v1 = vsel %vm327_vm0, %v949_v62, 0.0 }
 0x138   :  { %v964_v34 = vadd.f32 %v963_v32, %v962_v28  ;;  %v543_v50 = vadd.f32 %v1620_v5, %v1239_v43  ;;  %v952_v13 = vmul.f32 %v1772_v14, %v1772_v14  ;;  %v971_v18 = vsel %vm327_vm0, %v950_v45, 0.0 }
 0x139   :  { %v575_v3 = vsel %vm327_vm0, %v540_v48, 0.0  ;;  %v953_v5 = vmul.f32 %v1775_v21, %v1775_v21  ;;  %v973_v47 = vsel %vm327_vm0, %v951_v51, 0.0  ;;  %v954_v58 = vmul.f32 %v1778_v24, %v1778_v24 }
 0x13a   :  { %v966_v41 = vadd.f32 %v965_v55, %v964_v34  ;;  %v576_v56 = vadd.f32 %v575_v3, %v574_v37  ;;  %v577_v9 = vsel %vm327_vm0, %v543_v50, 0.0  ;;  %v975_v42 = vsel %vm327_vm0, %v952_v13, 0.0 }
 0x13b   :  { %v955_v28 = vmul.f32 %v1781_v39, %v1781_v39  ;;  %v977_v57 = vsel %vm327_vm0, %v953_v5, 0.0  ;;  %v956_v34 = vmul.f32 %v1784_v36, %v1784_v36  ;;  %v979_v62 = vsel %vm327_vm0, %v954_v58, 0.0 }
 0x13c   :  { %v968_v59 = vadd.f32 %v967_v46, %v966_v41  ;;  %v578_v23 = vadd.f32 %v577_v9, %v576_v56  ;;  %v957_v40 = vmul.f32 %v1786_v27, %v1786_v27  ;;  %v958_v46 = vmul.f32 %v1789_v44, %v1789_v44 }
 0x13d   :  { %v981_v41 = vsel %vm327_vm0, %v955_v28, 0.0  ;;  %v983_v51 = vsel %vm327_vm0, %v956_v34, 0.0 }
 0x13e   :  { %v970_v61 = vadd.f32 %v969_v1, %v968_v59  ;;  %v579_v6 = vrot.slane %v578_v23, 4  ;;  %v959_v59 = vmul.f32 %v1792_v12, %v1792_v12  ;;  %v987_v13 = vsel %vm327_vm0, %v958_v46, 0.0 }
 0x140   :  { %v972_v0 = vadd.f32 %v971_v18, %v970_v61  ;;  %v580_v38 = vadd.f32 %v579_v6, %v578_v23  ;;  %v985_v61 = vsel %vm327_vm0, %v957_v40, 0.0  ;;  %v989_v18 = vsel %vm327_vm0, %v959_v59, 0.0 }
 0x142   :  { %v974_v22 = vadd.f32 %v973_v47, %v972_v0  ;;  %v581_v32 = vrot.slane %v580_v38, 2 }
 0x144   :  { %v976_v52 = vadd.f32 %v975_v42, %v974_v22  ;;  %v582_v37 = vadd.f32 %v581_v32, %v580_v38 }
 0x146   :  { %v978_v29 = vadd.f32 %v977_v57, %v976_v52  ;;  %v583_v45 = vrot.slane %v582_v37, 1 }
 0x148   :  { %v980_v55 = vadd.f32 %v979_v62, %v978_v29  ;;  %v584_v3 = vadd.f32 %v583_v45, %v582_v37 }
 0x14a   :  { %v982_v43 = vadd.f32 %v981_v41, %v980_v55  ;;  %v586_v9 = vmul.f32 0.0078125, %v584_v3 }
 0x14c   :  { %v984_v1 = vadd.f32 %v983_v51, %v982_v43  ;;  %v1849_v23 = vsub.f32 %v1624_v8, %v586_v9  ;;  %v1852_v5 = vsub.f32 %v1626_v10, %v586_v9  ;;  %v1855_v47 = vsub.f32 %v1644_v25, %v586_v9 }
 0x14d   :  { %v1858_v22 = vsub.f32 %v1652_v31, %v586_v9  ;;  %v1861_v6 = vsub.f32 %v1668_v49, %v586_v9  ;;  %v1864_v58 = vsub.f32 %v1676_v63, %v586_v9  ;;  %v1867_v42 = vsub.f32 %v1693_v26, %v586_v9 }
 0x14e   :  { %v986_v56 = vadd.f32 %v985_v61, %v984_v1  ;;  %v1870_v52 = vsub.f32 %v1702_v33, %v586_v9  ;;  %v1873_v10 = vsub.f32 %v1717_v54, %v586_v9  ;;  %v1876_v25 = vsub.f32 %v1725_v11, %v586_v9 }
 0x14f   :  { %v1879_v31 = vsub.f32 %v1730_v30, %v586_v9  ;;  %v1882_v49 = vsub.f32 %v1735_v35, %v586_v9  ;;  %v1885_v63 = vsub.f32 %v1740_v53, %v586_v9  ;;  %v1888_v26 = vsub.f32 %v1745_v4, %v586_v9 }
 0x150   :  { %v988_v0 = vadd.f32 %v987_v13, %v986_v56  ;;  %v1890_v38 = vsub.f32 %v540_v48, %v586_v9  ;;  %v1892_v54 = vsub.f32 %v543_v50, %v586_v9  ;;  %v603_v11 = vmul.f32 %v1849_v23, %v1849_v23 }
 0x151   :  { %v604_v30 = vmul.f32 %v1852_v5, %v1852_v5  ;;  %v605_v35 = vmul.f32 %v1855_v47, %v1855_v47  ;;  %v606_v4 = vmul.f32 %v1858_v22, %v1858_v22  ;;  %v607_v32 = vmul.f32 %v1861_v6, %v1861_v6 }
 0x152   :  { %v990_v8 = vadd.f32 %v989_v18, %v988_v0  ;;  %v619_v57 = vsel %vm327_vm0, %v603_v11, 0.0  ;;  %v608_v37 = vmul.f32 %v1864_v58, %v1864_v58  ;;  %v609_v45 = vmul.f32 %v1867_v42, %v1867_v42 }
 0x153   :  { %v620_v48 = vsel %vm327_vm0, %v604_v30, 0.0  ;;  %v622_v34 = vsel %vm327_vm0, %v605_v35, 0.0  ;;  %v624_v40 = vsel %vm327_vm0, %v606_v4, 0.0  ;;  %v626_v46 = vsel %vm327_vm0, %v607_v32, 0.0  ;;  %v888_v32 = vld [vmem:[%s2030_s6] sm:$0x1] }
 0x154   :  { %v991_v33 = vrot.slane %v990_v8, 4  ;;  %v621_v29 = vadd.f32 %v620_v48, %v619_v57  ;;  %v610_v1 = vmul.f32 %v1870_v52, %v1870_v52  ;;  %v628_v3 = vsel %vm327_vm0, %v608_v37, 0.0 }
 0x155   :  { %v611_v9 = vmul.f32 %v1873_v10, %v1873_v10  ;;  %v630_v13 = vsel %vm327_vm0, %v609_v45, 0.0  ;;  %v660_v0 = vlaneseq  ;;  %v613_v30 = vmul.f32 %v1879_v31, %v1879_v31 }
 0x156   :  { %v992_v28 = vadd.f32 %v991_v33, %v990_v8  ;;  %v623_v55 = vadd.f32 %v622_v34, %v621_v29  ;;  %v612_v8 = vmul.f32 %v1876_v25, %v1876_v25  ;;  %v632_v33 = vsel %vm327_vm0, %v610_v1, 0.0 }
 0x157   :  { %v614_v4 = vmul.f32 %v1882_v49, %v1882_v49  ;;  %v638_v29 = vsel %vm327_vm0, %v613_v30, 0.0  ;;  %v617_v1 = vmul.f32 %v1890_v38, %v1890_v38 }
 0x158   :  { %v993_v53 = vrot.slane %v992_v28, 2  ;;  %v625_v43 = vadd.f32 %v624_v40, %v623_v55  ;;  %v636_v57 = vsel %vm327_vm0, %v612_v8, 0.0  ;;  %v616_v55 = vmul.f32 %v1888_v26, %v1888_v26 }
 0x159   :  { %v640_v37 = vsel %vm327_vm0, %v614_v4, 0.0 }
 0x15a   :  { %v994_v50 = vadd.f32 %v993_v53, %v992_v28  ;;  %v627_v51 = vadd.f32 %v626_v46, %v625_v43  ;;  %v634_v28 = vsel %vm327_vm0, %v611_v9, 0.0  ;;  %v1925_v53 = vshrl.u32 %v660_v0, 7 }
 0x15c   :  { %v995_v62 = vrot.slane %v994_v50, 1  ;;  %v629_v56 = vadd.f32 %v628_v3, %v627_v51  ;;  %v644_v51 = vsel %vm327_vm0, %v616_v55, 0.0 }
 0x15e   :  { %v996_v41 = vadd.f32 %v995_v62, %v994_v50  ;;  %v631_v18 = vadd.f32 %v630_v13, %v629_v56  ;;  %v615_v50 = vmul.f32 %v1885_v63, %v1885_v63  ;;  %v662_v62 = vsub.s32 0, %v1925_v53 }
 0x160   :  { %v997_v59 = vmul.f32 0.0078125, %v996_v41  ;;  %v633_v11 = vadd.f32 %v632_v33, %v631_v18  ;;  %v642_v45 = vsel %vm327_vm0, %v615_v50, 0.0 }
 0x162   :  { %v998_v61 = vadd.f32 1e-05, %v997_v59  ;;  %v635_v35 = vadd.f32 %v634_v28, %v633_v11 }
 0x164   :  { %1359 = vrsqrt.f32 %v998_v61  ;;  %v637_v48 = vadd.f32 %v636_v57, %v635_v35 }
 0x166   :  { %v639_v34 = vadd.f32 %v638_v29, %v637_v48 }
 0x168   :  { %v641_v41 = vadd.f32 %v640_v37, %v639_v34 }
 0x16a   :  { %v643_v46 = vadd.f32 %v642_v45, %v641_v41 }
 0x16c   :  { %v645_v3 = vadd.f32 %v644_v51, %v643_v46 }
 0x16e   :  { %v1360_v40 = vpop.eup %1359 }
 0x16f   :  { %v1000_v43 = vmul.f32 %v1360_v40, %v888_v32 }
 0x171   :  { %v1004_v59 = vrot.slane %v1000_v43, %v662_v62 }
 0x173   :  { %v1005_v61 = vmul.f32 %v1004_v59, %v1748_v15  ;;  %v1006_v56 = vmul.f32 %v1004_v59, %v1751_v16  ;;  %v1007_v9 = vmul.f32 %v1004_v59, %v1754_v2  ;;  %v1008_v13 = vmul.f32 %v1004_v59, %v1757_v60 }
 0x174   :  { %v1009_v18 = vmul.f32 %v1004_v59, %v1760_v19  ;;  %v1010_v0 = vmul.f32 %v1004_v59, %v1763_v7  ;;  %v1011_v8 = vmul.f32 %v1004_v59, %v1766_v20  ;;  %v1012_v33 = vmul.f32 %v1004_v59, %v1769_v17 }
 0x175   :  { %v1013_v11 = vmul.f32 %v1004_v59, %v1772_v14  ;;  %v1014_v30 = vmul.f32 %v1004_v59, %v1775_v21  ;;  %v1015_v15 = vmul.f32 %v1004_v59, %v1778_v24  ;;  %v1016_v16 = vmul.f32 %v1004_v59, %v1781_v39 }
 0x176   :  { %v1017_v2 = vmul.f32 %v1004_v59, %v1784_v36  ;;  %v1018_v60 = vmul.f32 %v1004_v59, %v1786_v27  ;;  %v1019_v19 = vmul.f32 %v1004_v59, %v1789_v44  ;;  %v618_v7 = vmul.f32 %v1892_v54, %v1892_v54  ;;  %v1175_v44 = vld [vmem:[%s2031_s7] ss:$0 sm:$0xff] }
 0x177   :  { %v646_v20 = vsel %vm327_vm0, %v617_v1, 0.0  ;;  %v1020_v14 = vmul.f32 %v1004_v59, %v1792_v12  ;;  %v546_v12 = vld [vmem:[%s2026_s2] sm:$0x1]  ;;  %v1027_v50 = vadd.f32 %v1175_v44, %v1005_v61  ;;  %v1028_v29 = vadd.f32 %v1175_v44, %v1006_v56 }
 0x178   :  { %v647_v17 = vadd.f32 %v646_v20, %v645_v3  ;;  %v648_v21 = vsel %vm327_vm0, %v618_v7, 0.0  ;;  %v1029_v32 = vadd.f32 %v1175_v44, %v1007_v9  ;;  %v1030_v34 = vadd.f32 %v1175_v44, %v1008_v13  ;;  %v1157_v13 = vld [vmem:[%s2027_s3] ss:$0 sm:$0xff]  ;;  %s1387_s3 = smov [#allocation2]  }
 0x179   :  { %v1031_v55 = vadd.f32 %v1175_v44, %v1009_v18  ;;  %v1032_v40 = vadd.f32 %v1175_v44, %v1010_v0  ;;  %v1033_v41 = vadd.f32 %v1175_v44, %v1011_v8  ;;  %v1034_v43 = vadd.f32 %v1175_v44, %v1012_v33  ;;  %s1096_s18 = sshll.u32 %s1387_s3, 4  ;;  %s1993_s18 = int_to_ptr.vmem [resolvable:$true] %s1096_s18 }
 0x17a   :  { %v649_v28 = vadd.f32 %v648_v21, %v647_v17  ;;  %v1035_v45 = vadd.f32 %v1175_v44, %v1013_v11  ;;  %v1036_v46 = vadd.f32 %v1175_v44, %v1014_v30  ;;  %v1037_v59 = vadd.f32 %v1175_v44, %v1015_v15  ;;  %s1363_s19 = scalar_lea.vmem %s1993_s18, 2048  ;;  %p1368_p1 = scmp.lt.s32.totalorder %s1993_s18, %s1993_s18 }
 0x17b   :  { %v1038_v51 = vadd.f32 %v1175_v44, %v1016_v16  ;;  %v1039_v3 = vadd.f32 %v1175_v44, %v1017_v2  ;;  %v1040_v7 = vadd.f32 %v1175_v44, %v1018_v60  ;;  %v1041_v20 = vadd.f32 %v1175_v44, %v1019_v19  ;;  %p1364_p0 = scmp.ne.s32.totalorder %s1993_s18, %s1363_s19  ;;  %p1369_p2 = scmp.lt.s32.totalorder %s1363_s19, %s1363_s19 }
 0x17c   :  { %v650_v24 = vrot.slane %v649_v28, 4  ;;  %v1042_v17 = vadd.f32 %v1175_v44, %v1020_v14 }
 0x17d   :  { %p1370_p3 = por %p1369_p2, %p1368_p1 }
 0x17e   :  { %v651_v35 = vadd.f32 %v650_v24, %v649_v28 }
 0x17f   :  { %p1371_p4 = pnand %p1370_p3, %p1364_p0 }
 0x180   :  { %v652_v39 = vrot.slane %v651_v35, 2 }
 0x182   :  { %v653_v53 = vadd.f32 %v652_v39, %v651_v35 }
 0x184   :  { %v654_v36 = vrot.slane %v653_v53, 1 }
 0x186   :  { %v655_v4 = vadd.f32 %v654_v36, %v653_v53 }
 0x188   :  { %v656_v27 = vmul.f32 0.0078125, %v655_v4 }
 0x18a   :  { %v657_v57 = vadd.f32 1e-05, %v656_v27 }
 0x18c   :  { %1361 = vrsqrt.f32 %v657_v57 }
 0x196   :  { %v1362_v48 = vpop.eup %1361 }
 0x197   :  { %v659_v37 = vmul.f32 %v1362_v48, %v546_v12 }
 0x199   :  { %v663_v1 = vrot.slane %v659_v37, %v662_v62 }
 0x19b   :  { %v664_v21 = vmul.f32 %v663_v1, %v1849_v23  ;;  %v665_v61 = vmul.f32 %v663_v1, %v1852_v5  ;;  %v666_v56 = vmul.f32 %v663_v1, %v1855_v47  ;;  %v667_v9 = vmul.f32 %v663_v1, %v1858_v22 }
 0x19c   :  { %v668_v18 = vmul.f32 %v663_v1, %v1861_v6  ;;  %v669_v62 = vmul.f32 %v663_v1, %v1864_v58  ;;  %v670_v0 = vmul.f32 %v663_v1, %v1867_v42  ;;  %v671_v8 = vmul.f32 %v663_v1, %v1870_v52 }
 0x19d   :  { %v672_v23 = vmul.f32 %v663_v1, %v1873_v10  ;;  %v673_v5 = vmul.f32 %v663_v1, %v1876_v25  ;;  %v674_v47 = vmul.f32 %v663_v1, %v1879_v31  ;;  %v675_v22 = vmul.f32 %v663_v1, %v1882_v49 }
 0x19e   :  { %v676_v33 = vmul.f32 %v663_v1, %v1885_v63  ;;  %v677_v11 = vmul.f32 %v663_v1, %v1888_v26  ;;  %v678_v6 = vmul.f32 %v663_v1, %v1890_v38  ;;  %v679_v58 = vmul.f32 %v663_v1, %v1892_v54 }
 0x19f   :  { %v686_v30 = vadd.f32 %v1157_v13, %v664_v21  ;;  %v687_v42 = vadd.f32 %v1157_v13, %v665_v61  ;;  %v688_v15 = vadd.f32 %v1157_v13, %v666_v56  ;;  %v689_v52 = vadd.f32 %v1157_v13, %v667_v9 }
 0x1a0   :  { %v690_v16 = vadd.f32 %v1157_v13, %v668_v18  ;;  %v691_v10 = vadd.f32 %v1157_v13, %v669_v62  ;;  %v692_v2 = vadd.f32 %v1157_v13, %v670_v0  ;;  %v693_v25 = vadd.f32 %v1157_v13, %v671_v8 }
 0x1a1   :  { %v694_v60 = vadd.f32 %v1157_v13, %v672_v23  ;;  %v695_v31 = vadd.f32 %v1157_v13, %v673_v5  ;;  %v696_v19 = vadd.f32 %v1157_v13, %v674_v47  ;;  %v697_v49 = vadd.f32 %v1157_v13, %v675_v22 }
 0x1a2   :  { %v698_v14 = vadd.f32 %v1157_v13, %v676_v33  ;;  %v699_v63 = vadd.f32 %v1157_v13, %v677_v11  ;;  %v700_v28 = vadd.f32 %v1157_v13, %v678_v6  ;;  %v701_v26 = vadd.f32 %v1157_v13, %v679_v58 }
 0x1a3   :  { %v1043_v24 = vadd.f32 %v1027_v50, %v686_v30  ;;  %v1044_v38 = vadd.f32 %v1028_v29, %v687_v42  ;;  %v1045_v35 = vadd.f32 %v1029_v32, %v688_v15  ;;  %v1046_v54 = vadd.f32 %v1030_v34, %v689_v52 }
 0x1a4   :  { %v1047_v39 = vadd.f32 %v1031_v55, %v690_v16  ;;  %v1048_v53 = vadd.f32 %v1032_v40, %v691_v10  ;;  %v1049_v36 = vadd.f32 %v1033_v41, %v692_v2  ;;  %v1050_v4 = vadd.f32 %v1034_v43, %v693_v25 }
 0x1a5   :  { %v1051_v27 = vadd.f32 %v1035_v45, %v694_v60  ;;  %v1052_v57 = vadd.f32 %v1036_v46, %v695_v31  ;;  %v1053_v44 = vadd.f32 %v1037_v59, %v696_v19  ;;  %v1054_v12 = vadd.f32 %v1038_v51, %v697_v49 }
 0x1a6   :  { %v1055_v48 = vadd.f32 %v1039_v3, %v698_v14  ;;  %v1056_v37 = vadd.f32 %v1040_v7, %v699_v63  ;;  %v1057_v1 = vadd.f32 %v1041_v20, %v700_v28  ;;  %v1058_v21 = vadd.f32 %v1042_v17, %v701_v26 }
 0x1a7   :  { %v1059_v61 = vmax.f32 %v1043_v24, 0.0  ;;  %v1060_v56 = vmax.f32 %v1044_v38, 0.0  ;;  %v1061_v50 = vmax.f32 %v1045_v35, 0.0  ;;  %v1062_v29 = vmax.f32 %v1046_v54, 0.0 }
 0x1a8   :  { %v1063_v32 = vmax.f32 %v1047_v39, 0.0  ;;  %v1064_v34 = vmax.f32 %v1048_v53, 0.0  ;;  %v1065_v55 = vmax.f32 %v1049_v36, 0.0  ;;  %v1066_v40 = vmax.f32 %v1050_v4, 0.0 }
 0x1a9   :  { %v1067_v41 = vmax.f32 %v1051_v27, 0.0  ;;  %v1068_v43 = vmax.f32 %v1052_v57, 0.0  ;;  %v1069_v45 = vmax.f32 %v1053_v44, 0.0  ;;  %v1070_v46 = vmax.f32 %v1054_v12, 0.0  ;;  %1075 = vst.msk [vmem:[#allocation2] sm:$0xff] %vm327_vm0, %v1059_v61  ;;  %1076 = vst.msk [vmem:[#allocation2 + $0x8] sm:$0xff] %vm327_vm0, %v1060_v56 }
 0x1aa   :  { %1077 = vst.msk [vmem:[#allocation2 + $0x10] sm:$0xff] %vm327_vm0, %v1061_v50  ;;  %1078 = vst.msk [vmem:[#allocation2 + $0x18] sm:$0xff] %vm327_vm0, %v1062_v29  ;;  %v1071_v59 = vmax.f32 %v1055_v48, 0.0  ;;  %v1072_v51 = vmax.f32 %v1056_v37, 0.0  ;;  %v1073_v3 = vmax.f32 %v1057_v1, 0.0  ;;  %v1074_v7 = vmax.f32 %v1058_v21, 0.0 }
 0x1ab   :  { %1079 = vst.msk [vmem:[#allocation2 + $0x20] sm:$0xff] %vm327_vm0, %v1063_v32  ;;  %1080 = vst.msk [vmem:[#allocation2 + $0x28] sm:$0xff] %vm327_vm0, %v1064_v34 }
 0x1ac   :  { %1081 = vst.msk [vmem:[#allocation2 + $0x30] sm:$0xff] %vm327_vm0, %v1065_v55  ;;  %1082 = vst.msk [vmem:[#allocation2 + $0x38] sm:$0xff] %vm327_vm0, %v1066_v40 }
 0x1ad   :  { %1083 = vst.msk [vmem:[#allocation2 + $0x40] sm:$0xff] %vm327_vm0, %v1067_v41  ;;  %1084 = vst.msk [vmem:[#allocation2 + $0x48] sm:$0xff] %vm327_vm0, %v1068_v43 }
 0x1ae   :  { %1085 = vst.msk [vmem:[#allocation2 + $0x50] sm:$0xff] %vm327_vm0, %v1069_v45  ;;  %1086 = vst.msk [vmem:[#allocation2 + $0x58] sm:$0xff] %vm327_vm0, %v1070_v46 }
 0x1af   :  { %1087 = vst.msk [vmem:[#allocation2 + $0x60] sm:$0xff] %vm327_vm0, %v1071_v59  ;;  %1088 = vst.msk [vmem:[#allocation2 + $0x68] sm:$0xff] %vm327_vm0, %v1072_v51 }
 0x1b0   :  { %1089 = vst.msk [vmem:[#allocation2 + $0x70] sm:$0xff] %vm327_vm0, %v1073_v3  ;;  %1090 = vst.msk [vmem:[#allocation2 + $0x78] sm:$0xff] %vm327_vm0, %v1074_v7 }
 0x1b1   :  { %1374 = shalt.err (!%p1371_p4)
}
 0x1b2   :  { %s1375_s1 = scalar_lea.hbm %s2032_s8, 2048 }
 0x1b3   :  { %p1376_p5 = scmp.ne.s32.totalorder %s2032_s8, %s1375_s1  ;;  %p1379_p6 = scmp.lt.u32.totalorder %s1375_s1, %s2032_s8 }
 0x1b5   :  { %p1381_p7 = pnand %p1379_p6, %p1376_p5 }
 0x1b7   :  { %1384 = shalt.err (!%p1381_p7)
}
 0x1b8   :  { %s1388_s25 = smov 128   ;;  %s1389_s26 = smov 8  }
 0x1b9   :  { %1102 = dma.vmem_to_hbm [thread:$0]  %s1993_s18, 2048, %s2032_s8, [#allocation3], %s1388_s25, %s1388_s25, %s1389_s26  }
 0x1ba   :  { %1385 = dma.done.wait [#allocation3], 2048  }
 0x1bb   :  { %1386 = vsyncadd [#allocation3], 4294965248 }
 0x1bc   :  { %1106 = vsyncpa [#allocation3], 1 }

</bundles_post_ra>
